<compile_context>
chip_gen: v5e
topology: v5e:2x2
jax: 0.10.0
libtpu: 0.0.40
codegen_flags: <defaults>
</compile_context>

<pallas_src>
import jax
import jax.numpy as jnp
from jax.experimental import pallas as pl
from jax.experimental.pallas import tpu as pltpu

# Logical layer sizes of the MLP: 784 -> 512 -> 256 -> 128 -> 60 -> 10
DIMS = [28 * 28, 512, 256, 128, 60, 10]
# Padded sizes used by the kernel (tail layers padded to a full 128-lane width).
PAD_DIMS = [28 * 28, 512, 256, 128, 128, 128]


def _round_up(n, m):
    return ((n + m - 1) // m) * m


def _choose_tb(B, block_b):
    """Pick the batch tile.

    Large B: largest multiple of 256 (full MXU M-axis on v6e/v7x) <= block_b
    that divides B (avoids the batch-pad copy); fall back to block_b.
    Small B: round up to 16 (bf16 sublane packing).  In both cases, if the
    grid would have a single step, halve TB (when it adds no extra padding)
    so the parallel batch axis can shard across both v7x TensorCores.
    """
    if B >= block_b:
        TB = block_b
        for cand in range(block_b, 255, -256):
            if B % cand == 0:
                TB = cand
                break
    else:
        TB = _round_up(B, 16)

    if _round_up(B, TB) // TB == 1 and TB >= 32:
        half = _round_up(TB // 2, 16)
        if _round_up(B, half) <= _round_up(B, TB):
            TB = half
    return TB


def _vmem_limit(TB):
    """Right-size the scoped VMEM limit for the chosen batch tile."""
    x_buf = 2 * TB * PAD_DIMS[0] * 2                      # bf16 input, double-buffered
    o_buf = 2 * TB * PAD_DIMS[-1] * 2                     # bf16 output, double-buffered
    w_buf = 2 * sum(PAD_DIMS[i] * PAD_DIMS[i + 1] for i in range(5)) * 2
    b_buf = 2 * sum(PAD_DIMS[1:]) * 4
    act = TB * (512 + 256) * 4                            # largest live f32 intermediates
    total = x_buf + o_buf + w_buf + b_buf + act
    return int(max(32 << 20, min(48 << 20, 2 * total)))


def mlp_kernel(x_ref,
               w1_ref, b1_ref,
               w2_ref, b2_ref,
               w3_ref, b3_ref,
               w4_ref, b4_ref,
               w5_ref, b5_ref,
               o_ref):
    """Fused 5-layer MLP with ReLU between layers (dropout = identity at eval).

    Activations are bf16 into each dot; accumulation is f32 on the MXU.
    """
    h = x_ref[...]  # bf16 (TB, 784)

    def layer(h, w_ref, b_ref, relu):
        acc = jnp.dot(h, w_ref[...], preferred_element_type=jnp.float32)
        acc = acc + b_ref[...]
        if relu:
            acc = jnp.maximum(acc, 0.0)
        return acc.astype(jnp.bfloat16)

    h = layer(h, w1_ref, b1_ref, relu=True)    # 784 -> 512
    h = layer(h, w2_ref, b2_ref, relu=True)    # 512 -> 256
    h = layer(h, w3_ref, b3_ref, relu=True)    # 256 -> 128
    h = layer(h, w4_ref, b4_ref, relu=True)    # 128 -> 128 (60 padded)
    h = layer(h, w5_ref, b5_ref, relu=False)   # 128 -> 128 (10 padded)

    o_ref[...] = h.astype(o_ref.dtype)


def prepare_params(params):
    """One-time padding + bf16 cast of the weights (hoisted out of forward).

    params: list of (W_t, b) with W_t of shape (in, out), b of shape (1, out),
    f32, at the *logical* sizes.  Returns the flat list of padded bf16 weights
    and padded f32 biases consumed by neural_network_forward().
    """
    flat = []
    for li, (w, b) in enumerate(params):
        in_p, out_p = PAD_DIMS[li], PAD_DIMS[li + 1]
        w_pad = jnp.zeros((in_p, out_p), jnp.float32)
        w_pad = w_pad.at[:w.shape[0], :w.shape[1]].set(w).astype(jnp.bfloat16)
        b_pad = jnp.zeros((1, out_p), jnp.float32).at[:, :b.shape[1]].set(b)
        flat.append(w_pad)
        flat.append(b_pad)
    return flat


def neural_network_forward(x, flat_params, *, block_b=1024):
    """x: (B, 1, 28, 28) float32 (NCHW).  flat_params: output of prepare_params.

    Returns (B, 10) float32 logits.
    """
    B = x.shape[0]
    x_flat = x.reshape(B, -1).astype(jnp.bfloat16)  # nn.Flatten(): (B, 784)

    TB = _choose_tb(B, block_b)
    Bp = _round_up(B, TB)
    if Bp != B:
        # Only hit for ragged/small batches; large batches pick TB | B above.
        x_flat = jnp.pad(x_flat, ((0, Bp - B), (0, 0)))

    in_specs = [pl.BlockSpec((TB, PAD_DIMS[0]), lambda i: (i, 0))]
    for li in range(5):
        in_p, out_p = PAD_DIMS[li], PAD_DIMS[li + 1]
        # Constant index maps: weights/biases stay VMEM-resident across steps.
        in_specs.append(pl.BlockSpec((in_p, out_p), lambda i: (0, 0)))
        in_specs.append(pl.BlockSpec((1, out_p), lambda i: (0, 0)))

    out = pl.pallas_call(
        mlp_kernel,
        out_shape=jax.ShapeDtypeStruct((Bp, PAD_DIMS[-1]), jnp.bfloat16),
        grid=(Bp // TB,),
        in_specs=in_specs,
        out_specs=pl.BlockSpec((TB, PAD_DIMS[-1]), lambda i: (i, 0)),
        compiler_params=pltpu.CompilerParams(
            dimension_semantics=("parallel",),
            vmem_limit_bytes=_vmem_limit(TB),
        ),
    )(x_flat, *flat_params)

    # Slice away batch padding and logit-lane padding; upcast logits to f32.
    return out[:B, :DIMS[-1]].astype(jnp.float32)


def init_params(key):
    """Deterministic init mimicking PyTorch nn.Linear default
    (uniform +/- 1/sqrt(fan_in)).  Weights stored transposed (in, out)."""
    params = []
    for i in range(len(DIMS) - 1):
        fan_in, fan_out = DIMS[i], DIMS[i + 1]
        key, kw, kb = jax.random.split(key, 3)
        bound = 1.0 / jnp.sqrt(float(fan_in))
        w_t = jax.random.uniform(kw, (fan_in, fan_out), jnp.float32, -bound, bound)
        b = jax.random.uniform(kb, (1, fan_out), jnp.float32, -bound, bound)
        params.append((w_t, b))
    return params


if __name__ == "__main__":
    key = jax.random.PRNGKey(0)
    key, kx = jax.random.split(key)

    B = 8
    x = jax.random.normal(kx, (B, 1, 28, 28), dtype=jnp.float32)  # NCHW like MNIST
    params = init_params(key)
    flat_params = prepare_params(params)  # padded + bf16, done once

    out = neural_network_forward(x, flat_params)
    jax.block_until_ready(out)

    assert out.shape == (B, 10), out.shape

    # Pure-JAX reference mirroring the kernel numerics
    # (bf16 inputs/weights, f32 accum, bf16 inter-layer activations, bf16 logits).
    h = x.reshape(B, -1).astype(jnp.bfloat16)
    for i, (w, b) in enumerate(params):
        acc = jnp.dot(h, w.astype(jnp.bfloat16),
                      preferred_element_type=jnp.float32) + b
        if i < len(params) - 1:
            h = jnp.maximum(acc, 0.0).astype(jnp.bfloat16)
        else:
            h = acc.astype(jnp.bfloat16)
    ref = h.astype(jnp.float32)

    assert jnp.allclose(out, ref, atol=2e-2, rtol=2e-2), (
        float(jnp.max(jnp.abs(out - ref))))

    print("KERNEL_OK")
</pallas_src>

<mosaic_0001>
module attributes {stable_mosaic.version = 11 : i64} {
  func.func @mlp_kernel(%arg0: i32, %arg1: memref<16x784xbf16, #tpu.memory_space<vmem>>, %arg2: memref<784x512xbf16, #tpu.memory_space<vmem>>, %arg3: memref<1x512xf32, #tpu.memory_space<vmem>>, %arg4: memref<512x256xbf16, #tpu.memory_space<vmem>>, %arg5: memref<1x256xf32, #tpu.memory_space<vmem>>, %arg6: memref<256x128xbf16, #tpu.memory_space<vmem>>, %arg7: memref<1x128xf32, #tpu.memory_space<vmem>>, %arg8: memref<128x128xbf16, #tpu.memory_space<vmem>>, %arg9: memref<1x128xf32, #tpu.memory_space<vmem>>, %arg10: memref<128x128xbf16, #tpu.memory_space<vmem>>, %arg11: memref<1x128xf32, #tpu.memory_space<vmem>>, %arg12: memref<16x128xbf16, #tpu.memory_space<vmem>>) attributes {dimension_semantics = [#tpu.dimension_semantics<parallel>], iteration_bounds = array<i64: 1>, scalar_prefetch = 0 : i64, scratch_operands = 0 : i64, tpu.core_type = #tpu.core_type<tc>, window_params = [{transform_indices = @transform_0, window_bounds = array<i64: 16, 784>}, {pipeline_mode = #tpu.pipeline_mode<synchronous>, transform_indices = @transform_1, window_bounds = array<i64: 784, 512>}, {pipeline_mode = #tpu.pipeline_mode<synchronous>, transform_indices = @transform_2, window_bounds = array<i64: 1, 512>}, {pipeline_mode = #tpu.pipeline_mode<synchronous>, transform_indices = @transform_3, window_bounds = array<i64: 512, 256>}, {pipeline_mode = #tpu.pipeline_mode<synchronous>, transform_indices = @transform_4, window_bounds = array<i64: 1, 256>}, {pipeline_mode = #tpu.pipeline_mode<synchronous>, transform_indices = @transform_5, window_bounds = array<i64: 256, 128>}, {pipeline_mode = #tpu.pipeline_mode<synchronous>, transform_indices = @transform_6, window_bounds = array<i64: 1, 128>}, {pipeline_mode = #tpu.pipeline_mode<synchronous>, transform_indices = @transform_7, window_bounds = array<i64: 128, 128>}, {pipeline_mode = #tpu.pipeline_mode<synchronous>, transform_indices = @transform_8, window_bounds = array<i64: 1, 128>}, {pipeline_mode = #tpu.pipeline_mode<synchronous>, transform_indices = @transform_9, window_bounds = array<i64: 128, 128>}, {pipeline_mode = #tpu.pipeline_mode<synchronous>, transform_indices = @transform_10, window_bounds = array<i64: 1, 128>}, {transform_indices = @transform_11, window_bounds = array<i64: 16, 128>}]} {
    %c0 = arith.constant 0 : index
    %c0_0 = arith.constant 0 : index
    %0 = vector.load %arg1[%c0, %c0_0] : memref<16x784xbf16, #tpu.memory_space<vmem>>, vector<16x784xbf16>
    %c0_1 = arith.constant 0 : index
    %c0_2 = arith.constant 0 : index
    %1 = vector.load %arg2[%c0_1, %c0_2] : memref<784x512xbf16, #tpu.memory_space<vmem>>, vector<784x512xbf16>
    %cst = arith.constant dense<0.000000e+00> : vector<16x512xf32>
    %2 = tpu.matmul %0, %1, %cst {dimension_numbers = #tpu.dot_dimension_numbers<[1], [0], [0], [1], [0, 0, 1, 1], [], []>} : vector<16x784xbf16>, vector<784x512xbf16>, vector<16x512xf32> -> vector<16x512xf32>
    %c0_3 = arith.constant 0 : index
    %c0_4 = arith.constant 0 : index
    %3 = vector.load %arg3[%c0_3, %c0_4] : memref<1x512xf32, #tpu.memory_space<vmem>>, vector<1x512xf32>
    %4 = vector.broadcast %3 : vector<1x512xf32> to vector<16x512xf32>
    %5 = arith.addf %2, %4 : vector<16x512xf32>
    %cst_5 = arith.constant 0.000000e+00 : f32
    %6 = vector.broadcast %cst_5 : f32 to vector<16x512xf32>
    %7 = arith.maximumf %5, %6 : vector<16x512xf32>
    %8 = arith.truncf %7 : vector<16x512xf32> to vector<16x512xbf16>
    %c0_6 = arith.constant 0 : index
    %c0_7 = arith.constant 0 : index
    %9 = vector.load %arg4[%c0_6, %c0_7] : memref<512x256xbf16, #tpu.memory_space<vmem>>, vector<512x256xbf16>
    %cst_8 = arith.constant dense<0.000000e+00> : vector<16x256xf32>
    %10 = tpu.matmul %8, %9, %cst_8 {dimension_numbers = #tpu.dot_dimension_numbers<[1], [0], [0], [1], [0, 0, 1, 1], [], []>} : vector<16x512xbf16>, vector<512x256xbf16>, vector<16x256xf32> -> vector<16x256xf32>
    %c0_9 = arith.constant 0 : index
    %c0_10 = arith.constant 0 : index
    %11 = vector.load %arg5[%c0_9, %c0_10] : memref<1x256xf32, #tpu.memory_space<vmem>>, vector<1x256xf32>
    %12 = vector.broadcast %11 : vector<1x256xf32> to vector<16x256xf32>
    %13 = arith.addf %10, %12 : vector<16x256xf32>
    %cst_11 = arith.constant 0.000000e+00 : f32
    %14 = vector.broadcast %cst_11 : f32 to vector<16x256xf32>
    %15 = arith.maximumf %13, %14 : vector<16x256xf32>
    %16 = arith.truncf %15 : vector<16x256xf32> to vector<16x256xbf16>
    %c0_12 = arith.constant 0 : index
    %c0_13 = arith.constant 0 : index
    %17 = vector.load %arg6[%c0_12, %c0_13] : memref<256x128xbf16, #tpu.memory_space<vmem>>, vector<256x128xbf16>
    %cst_14 = arith.constant dense<0.000000e+00> : vector<16x128xf32>
    %18 = tpu.matmul %16, %17, %cst_14 {dimension_numbers = #tpu.dot_dimension_numbers<[1], [0], [0], [1], [0, 0, 1, 1], [], []>} : vector<16x256xbf16>, vector<256x128xbf16>, vector<16x128xf32> -> vector<16x128xf32>
    %c0_15 = arith.constant 0 : index
    %c0_16 = arith.constant 0 : index
    %19 = vector.load %arg7[%c0_15, %c0_16] : memref<1x128xf32, #tpu.memory_space<vmem>>, vector<1x128xf32>
    %20 = vector.broadcast %19 : vector<1x128xf32> to vector<16x128xf32>
    %21 = arith.addf %18, %20 : vector<16x128xf32>
    %cst_17 = arith.constant 0.000000e+00 : f32
    %22 = vector.broadcast %cst_17 : f32 to vector<16x128xf32>
    %23 = arith.maximumf %21, %22 : vector<16x128xf32>
    %24 = arith.truncf %23 : vector<16x128xf32> to vector<16x128xbf16>
    %c0_18 = arith.constant 0 : index
    %c0_19 = arith.constant 0 : index
    %25 = vector.load %arg8[%c0_18, %c0_19] : memref<128x128xbf16, #tpu.memory_space<vmem>>, vector<128x128xbf16>
    %cst_20 = arith.constant dense<0.000000e+00> : vector<16x128xf32>
    %26 = tpu.matmul %24, %25, %cst_20 {dimension_numbers = #tpu.dot_dimension_numbers<[1], [0], [0], [1], [0, 0, 1, 1], [], []>} : vector<16x128xbf16>, vector<128x128xbf16>, vector<16x128xf32> -> vector<16x128xf32>
    %c0_21 = arith.constant 0 : index
    %c0_22 = arith.constant 0 : index
    %27 = vector.load %arg9[%c0_21, %c0_22] : memref<1x128xf32, #tpu.memory_space<vmem>>, vector<1x128xf32>
    %28 = vector.broadcast %27 : vector<1x128xf32> to vector<16x128xf32>
    %29 = arith.addf %26, %28 : vector<16x128xf32>
    %cst_23 = arith.constant 0.000000e+00 : f32
    %30 = vector.broadcast %cst_23 : f32 to vector<16x128xf32>
    %31 = arith.maximumf %29, %30 : vector<16x128xf32>
    %32 = arith.truncf %31 : vector<16x128xf32> to vector<16x128xbf16>
    %c0_24 = arith.constant 0 : index
    %c0_25 = arith.constant 0 : index
    %33 = vector.load %arg10[%c0_24, %c0_25] : memref<128x128xbf16, #tpu.memory_space<vmem>>, vector<128x128xbf16>
    %cst_26 = arith.constant dense<0.000000e+00> : vector<16x128xf32>
    %34 = tpu.matmul %32, %33, %cst_26 {dimension_numbers = #tpu.dot_dimension_numbers<[1], [0], [0], [1], [0, 0, 1, 1], [], []>} : vector<16x128xbf16>, vector<128x128xbf16>, vector<16x128xf32> -> vector<16x128xf32>
    %c0_27 = arith.constant 0 : index
    %c0_28 = arith.constant 0 : index
    %35 = vector.load %arg11[%c0_27, %c0_28] : memref<1x128xf32, #tpu.memory_space<vmem>>, vector<1x128xf32>
    %36 = vector.broadcast %35 : vector<1x128xf32> to vector<16x128xf32>
    %37 = arith.addf %34, %36 : vector<16x128xf32>
    %38 = arith.truncf %37 : vector<16x128xf32> to vector<16x128xbf16>
    %c0_29 = arith.constant 0 : index
    %c0_30 = arith.constant 0 : index
    %39 = vector.load %arg12[%c0_29, %c0_30] : memref<16x128xbf16, #tpu.memory_space<vmem>>, vector<16x128xbf16>
    tpu.vector_store %arg12[%c0_29, %c0_30], %38 {strides = array<i32>} : memref<16x128xbf16, #tpu.memory_space<vmem>>, vector<16x128xbf16>,
    return
  }
  func.func @transform_0(%arg0: i32) -> (i32, i32) {
    %c0_i32 = arith.constant 0 : i32
    %c0_i32_0 = arith.constant 0 : i32
    return %arg0, %c0_i32 : i32, i32
  }
  func.func @transform_1(%arg0: i32) -> (i32, i32) {
    %c0_i32 = arith.constant 0 : i32
    %c0_i32_0 = arith.constant 0 : i32
    %c0_i32_1 = arith.constant 0 : i32
    return %c0_i32, %c0_i32_0 : i32, i32
  }
  func.func @transform_2(%arg0: i32) -> (i32, i32) {
    %c0_i32 = arith.constant 0 : i32
    %c0_i32_0 = arith.constant 0 : i32
    %c0_i32_1 = arith.constant 0 : i32
    return %c0_i32, %c0_i32_0 : i32, i32
  }
  func.func @transform_3(%arg0: i32) -> (i32, i32) {
    %c0_i32 = arith.constant 0 : i32
    %c0_i32_0 = arith.constant 0 : i32
    %c0_i32_1 = arith.constant 0 : i32
    return %c0_i32, %c0_i32_0 : i32, i32
  }
  func.func @transform_4(%arg0: i32) -> (i32, i32) {
    %c0_i32 = arith.constant 0 : i32
    %c0_i32_0 = arith.constant 0 : i32
    %c0_i32_1 = arith.constant 0 : i32
    return %c0_i32, %c0_i32_0 : i32, i32
  }
  func.func @transform_5(%arg0: i32) -> (i32, i32) {
    %c0_i32 = arith.constant 0 : i32
    %c0_i32_0 = arith.constant 0 : i32
    %c0_i32_1 = arith.constant 0 : i32
    return %c0_i32, %c0_i32_0 : i32, i32
  }
  func.func @transform_6(%arg0: i32) -> (i32, i32) {
    %c0_i32 = arith.constant 0 : i32
    %c0_i32_0 = arith.constant 0 : i32
    %c0_i32_1 = arith.constant 0 : i32
    return %c0_i32, %c0_i32_0 : i32, i32
  }
  func.func @transform_7(%arg0: i32) -> (i32, i32) {
    %c0_i32 = arith.constant 0 : i32
    %c0_i32_0 = arith.constant 0 : i32
    %c0_i32_1 = arith.constant 0 : i32
    return %c0_i32, %c0_i32_0 : i32, i32
  }
  func.func @transform_8(%arg0: i32) -> (i32, i32) {
    %c0_i32 = arith.constant 0 : i32
    %c0_i32_0 = arith.constant 0 : i32
    %c0_i32_1 = arith.constant 0 : i32
    return %c0_i32, %c0_i32_0 : i32, i32
  }
  func.func @transform_9(%arg0: i32) -> (i32, i32) {
    %c0_i32 = arith.constant 0 : i32
    %c0_i32_0 = arith.constant 0 : i32
    %c0_i32_1 = arith.constant 0 : i32
    return %c0_i32, %c0_i32_0 : i32, i32
  }
  func.func @transform_10(%arg0: i32) -> (i32, i32) {
    %c0_i32 = arith.constant 0 : i32
    %c0_i32_0 = arith.constant 0 : i32
    %c0_i32_1 = arith.constant 0 : i32
    return %c0_i32, %c0_i32_0 : i32, i32
  }
  func.func @transform_11(%arg0: i32) -> (i32, i32) {
    %c0_i32 = arith.constant 0 : i32
    %c0_i32_0 = arith.constant 0 : i32
    return %arg0, %c0_i32 : i32, i32
  }
}

</mosaic_0001>

<bundles_post_ra>
// kernel: tpu_custom_call.1
= control target key start
LH: loop header
LB: loop body
LE: loop exit
PB: predicated region body
PF: predicated region fallthrough
CT: control target
= control target key end

     0   :  { %16 = vsyncpa [#allocation3], 0  ;;  %s4562_s0 = inlined_call_operand.hbm [shape: bf16[16,784], index: 0, kind: input, shape index: {}]   ;;  %s4563_s1 = inlined_call_operand.hbm [shape: bf16[784,512], index: 1, kind: input, shape index: {}]   ;;  %s4564_s2 = inlined_call_operand.hbm [shape: f32[1,512], index: 2, kind: input, shape index: {}]   ;;  %s4565_s3 = inlined_call_operand.hbm [shape: bf16[512,256], index: 3, kind: input, shape index: {}]   ;;  %s4566_s4 = inlined_call_operand.vmem [shape: f32[1,256], index: 4, kind: input, shape index: {}]   ;;  %s4567_s5 = inlined_call_operand.hbm [shape: bf16[256,128], index: 5, kind: input, shape index: {}]   ;;  %s4568_s6 = inlined_call_operand.vmem [shape: f32[1,128], index: 6, kind: input, shape index: {}]   ;;  %s4569_s7 = inlined_call_operand.hbm [shape: bf16[128,128], index: 7, kind: input, shape index: {}]   ;;  %s4570_s8 = inlined_call_operand.vmem [shape: f32[1,128], index: 8, kind: input, shape index: {}]   ;;  %s4571_s9 = inlined_call_operand.hbm [shape: bf16[128,128], index: 9, kind: input, shape index: {}]   ;;  %s4572_s10 = inlined_call_operand.vmem [shape: f32[1,128], index: 10, kind: input, shape index: {}]   ;;  %s4573_s11 = inlined_call_operand.hbm [shape: bf16[16,128], index: 11, kind: output, shape index: {}]  }
   0x1   :  { %17 = vsyncpa [#allocation6], 0 }
   0x2   :  { %18 = vsyncpa [#allocation9], 0 }
   0x3   :  { %19 = vsyncpa [#allocation12], 0  ;;  %s38_s19 = sshll.u32 %s4563_s1, 4  ;;  %s39_s19 = int_to_ptr.hbm [resolvable:$true] %s38_s19 }
   0x4   :  { %20 = vsyncpa [#allocation4], 0  ;;  %s4373_s20 = smov [#allocation5]   ;;  %s62_s24 = sshll.u32 %s4565_s3, 4  ;;  %s63_s24 = int_to_ptr.hbm [resolvable:$true] %s62_s24 }
   0x5   :  { %s40_s21 = sshll.u32 %s4373_s20, 4  ;;  %s4374_s25 = smov 256   ;;  %s41_s21 = int_to_ptr.vmem [resolvable:$true] %s40_s21 }
   0x6   :  { %s4375_s26 = smov 16   ;;  %s4376_s27 = smov [#allocation8]  }
   0x7   :  { %46 = dma.hbm_to_vmem [thread:$0]  %s39_s19, 25088, %s41_s21, [#allocation6], %s4374_s25, %s4374_s25, %s4375_s26  }
   0x8   :  { %s64_s28 = sshll.u32 %s4376_s27, 4  ;;  %s4377_s29 = smov 128   ;;  %s65_s28 = int_to_ptr.vmem [resolvable:$true] %s64_s28 }
   0x9   :  { %s4378_s30 = smov 8   ;;  %s92_s13 = sshll.u32 %s4569_s7, 4  ;;  %s93_s13 = int_to_ptr.hbm [resolvable:$true] %s92_s13 }
   0xa   :  { %70 = dma.hbm_to_vmem [thread:$0]  %s63_s24, 8192, %s65_s28, [#allocation9], %s4377_s29, %s4377_s29, %s4378_s30  }
   0xb   :  { %s4379_s14 = smov [#allocation11]   ;;  %s25_s17 = sshll.u32 %s4562_s0, 4  ;;  %s26_s17 = int_to_ptr.hbm [resolvable:$true] %s25_s17 }
   0xc   :  { %s94_s15 = sshll.u32 %s4379_s14, 4  ;;  %s4380_s18 = smov 64   ;;  %s95_s15 = int_to_ptr.vmem [resolvable:$true] %s94_s15 }
   0xd   :  { %s4381_s19 = smov 4   ;;  %s4382_s20 = smov [#allocation2]  }
   0xe   :  { %100 = dma.hbm_to_vmem [thread:$0]  %s93_s13, 1024, %s95_s15, [#allocation12], %s4380_s18, %s4380_s18, %s4381_s19  }
   0xf   :  { %s27_s21 = sshll.u32 %s4382_s20, 4  ;;  %s4383_s22 = smov 448   ;;  %s28_s21 = int_to_ptr.vmem [resolvable:$true] %s27_s21 }
  0x10   :  { %s4384_s7 = smov 28   ;;  %s52_s25 = sshll.u32 %s4564_s2, 4  ;;  %s53_s25 = int_to_ptr.hbm [resolvable:$true] %s52_s25 }
  0x11   :  { %33 = dma.hbm_to_vmem [thread:$0]  %s26_s17, 896, %s28_s21, [#allocation3], %s4383_s22, %s4383_s22, %s4384_s7  }
  0x12   :  { %s4385_s26 = smov [#allocation7]   ;;  %s77_s29 = sshll.u32 %s4567_s5, 4  ;;  %s78_s29 = int_to_ptr.hbm [resolvable:$true] %s77_s29 }
  0x13   :  { %s54_s0 = sshll.u32 %s4385_s26, 4  ;;  %s4386_s30 = smov [#allocation10]   ;;  %s55_s0 = int_to_ptr.vmem [resolvable:$true] %s54_s0 }
  0x14   :  { %57 = dma.hbm_to_vmem [thread:$0]  %s53_s25, 64, %s55_s0, [#allocation6]  }
  0x15   :  { %s79_s1 = sshll.u32 %s4386_s30, 4  ;;  %s107_s14 = sshll.u32 %s4571_s9, 4  ;;  %s80_s1 = int_to_ptr.vmem [resolvable:$true] %s79_s1  ;;  %s108_s14 = int_to_ptr.hbm [resolvable:$true] %s107_s14 }
  0x16   :  { %85 = dma.hbm_to_vmem [thread:$0]  %s78_s29, 2048, %s80_s1, [#allocation9], %s4380_s18, %s4380_s18, %s4381_s19  }
  0x17   :  { %s4387_s2 = smov [#allocation13]  }
  0x18   :  { %s109_s15 = sshll.u32 %s4387_s2, 4  ;;  %s110_s15 = int_to_ptr.vmem [resolvable:$true] %s109_s15 }
  0x19   :  { %115 = dma.hbm_to_vmem [thread:$0]  %s108_s14, 1024, %s110_s15, [#allocation12], %s4380_s18, %s4380_s18, %s4381_s19  }
  0x1a   :  { %4363 = dma.done.wait [#allocation3], 896  }
  0x1b   :  { %4364 = vsyncadd [#allocation3], 4294966400 }
  0x1c   :  { %4365 = dma.done.wait [#allocation6], 25152  }
  0x1d   :  { %4366 = vsyncadd [#allocation6], 4294942144 }
  0x1e   :  { %4367 = dma.done.wait [#allocation9], 10240  }
  0x1f   :  { %4368 = vsyncadd [#allocation9], 4294957056 }
  0x20   :  { %4369 = dma.done.wait [#allocation12], 2048  }
  0x21   :  { %4370 = vsyncadd [#allocation12], 4294965248  ;;  %v2790_v0 = vld [vmem:[#allocation5 + $0xe0] sm:$0xf]  ;;  %v3885_v1 = vld [vmem:[#allocation5 + $0xec] sm:$0xf0] }
  0x22   :  { %v2918_v2 = vld [vmem:[#allocation5 + $0x1e0] sm:$0xf]  ;;  %v2791_v3 = vor.u32 %v3885_v1, %v2790_v0  ;;  %v3917_v4 = vld [vmem:[#allocation5 + $0x1ec] sm:$0xf0]  ;;  %vm1376_vm0 = vcmask 130048   ;;  %s4388_s21 = smov [#allocation14]  }
  0x23   :  { %v3046_v5 = vld [vmem:[#allocation5 + $0x2e0] sm:$0xf]  ;;  %v3949_v6 = vld [vmem:[#allocation5 + $0x2ec] sm:$0xf0]  ;;  %v2919_v7 = vor.u32 %v3917_v4, %v2918_v2  ;;  %s2630_s22 = sshll.u32 %s4388_s21, 4  ;;  %s2632_s24 = sshll.u32 %s4573_s11, 4  ;;  %s2631_s22 = int_to_ptr.vmem [resolvable:$true] %s2630_s22  ;;  %s2633_s24 = int_to_ptr.hbm [resolvable:$true] %s2632_s24 }
  0x24   :  { %v3047_v8 = vor.u32 %v3949_v6, %v3046_v5  ;;  %v3174_v9 = vld [vmem:[#allocation5 + $0x3e0] sm:$0xf]  ;;  %v3981_v10 = vld [vmem:[#allocation5 + $0x3ec] sm:$0xf0]  ;;  %1380 = vmatpush.bf16.msra.mxu0 %v2791_v3 }
  0x25   :  { %v2774_v11 = vld [vmem:[#allocation5 + $0xc0] sm:$0xf]  ;;  %v3175_v12 = vor.u32 %v3981_v10, %v3174_v9  ;;  %v3881_v13 = vld [vmem:[#allocation5 + $0xcc] sm:$0xf0]  ;;  %1394 = vmatpush.bf16.msra.mxu1 %v2919_v7 }
  0x26   :  { %v2902_v14 = vld [vmem:[#allocation5 + $0x1c0] sm:$0xf]  ;;  %v3913_v15 = vld [vmem:[#allocation5 + $0x1cc] sm:$0xf0]  ;;  %1408 = vmatpush.bf16.msra.mxu2 %v3047_v8  ;;  %v2775_v16 = vor.u32 %v3881_v13, %v2774_v11 }
  0x27   :  { %v2903_v17 = vor.u32 %v3913_v15, %v2902_v14  ;;  %v3030_v18 = vld [vmem:[#allocation5 + $0x2c0] sm:$0xf]  ;;  %v3945_v19 = vld [vmem:[#allocation5 + $0x2cc] sm:$0xf0]  ;;  %1422 = vmatpush.bf16.msra.mxu3 %v3175_v12 }
  0x28   :  { %v3158_v20 = vld [vmem:[#allocation5 + $0x3c0] sm:$0xf]  ;;  %v3031_v21 = vor.u32 %v3945_v19, %v3030_v18  ;;  %v3977_v22 = vld [vmem:[#allocation5 + $0x3cc] sm:$0xf0]  ;;  %1381 = vmatpush.bf16.msra.mxu0 %v2775_v16 }
  0x29   :  { %v2758_v23 = vld [vmem:[#allocation5 + $0xa0] sm:$0xf]  ;;  %v3877_v24 = vld [vmem:[#allocation5 + $0xac] sm:$0xf0]  ;;  %v3159_v25 = vor.u32 %v3977_v22, %v3158_v20  ;;  %1395 = vmatpush.bf16.msra.mxu1 %v2903_v17 }
  0x2a   :  { %v2886_v26 = vld [vmem:[#allocation5 + $0x1a0] sm:$0xf]  ;;  %v3909_v27 = vld [vmem:[#allocation5 + $0x1ac] sm:$0xf0]  ;;  %v2759_v29 = vor.u32 %v3877_v24, %v2758_v23  ;;  %1409 = vmatpush.bf16.msra.mxu2 %v3031_v21 }
  0x2b   :  { %v3014_v28 = vld [vmem:[#allocation5 + $0x2a0] sm:$0xf]  ;;  %v3941_v30 = vld [vmem:[#allocation5 + $0x2ac] sm:$0xf0]  ;;  %v2887_v33 = vor.u32 %v3909_v27, %v2886_v26  ;;  %1423 = vmatpush.bf16.msra.mxu3 %v3159_v25 }
  0x2c   :  { %v3142_v31 = vld [vmem:[#allocation5 + $0x3a0] sm:$0xf]  ;;  %v3973_v32 = vld [vmem:[#allocation5 + $0x3ac] sm:$0xf0]  ;;  %v3015_v34 = vor.u32 %v3941_v30, %v3014_v28  ;;  %1382 = vmatpush.bf16.msra.mxu0 %v2759_v29 }
  0x2d   :  { %v2742_v35 = vld [vmem:[#allocation5 + $0x80] sm:$0xf]  ;;  %v3873_v36 = vld [vmem:[#allocation5 + $0x8c] sm:$0xf0]  ;;  %v3143_v38 = vor.u32 %v3973_v32, %v3142_v31  ;;  %1396 = vmatpush.bf16.msra.mxu1 %v2887_v33  ;;  %v3883_v32 = vld [vmem:[#allocation5 + $0xe4] sm:$0xf] }
  0x2e   :  { %v2870_v37 = vld [vmem:[#allocation5 + $0x180] sm:$0xf]  ;;  %v3905_v39 = vld [vmem:[#allocation5 + $0x18c] sm:$0xf0]  ;;  %v2743_v44 = vor.u32 %v3873_v36, %v2742_v35  ;;  %1410 = vmatpush.bf16.msra.mxu2 %v3015_v34  ;;  %v2792_v33 = vld [vmem:[#allocation5 + $0xf0] sm:$0xf0] }
  0x2f   :  { %v2998_v40 = vld [vmem:[#allocation5 + $0x280] sm:$0xf]  ;;  %v3937_v41 = vld [vmem:[#allocation5 + $0x28c] sm:$0xf0]  ;;  %v2871_v45 = vor.u32 %v3905_v39, %v2870_v37  ;;  %1424 = vmatpush.bf16.msra.mxu3 %v3143_v38  ;;  %v3852_v36 = vld [vmem:[#allocation2 + $0x20] sm:$0xf0] }
  0x30   :  { %v3126_v42 = vld [vmem:[#allocation5 + $0x380] sm:$0xf]  ;;  %v3969_v43 = vld [vmem:[#allocation5 + $0x38c] sm:$0xf0]  ;;  %v2999_v46 = vor.u32 %v3937_v41, %v2998_v40  ;;  %1383 = vmatpush.bf16.msra.mxu0 %v2743_v44  ;;  %v3915_v41 = vld [vmem:[#allocation5 + $0x1e4] sm:$0xf] }
  0x31   :  { %v2726_v47 = vld [vmem:[#allocation5 + $0x60] sm:$0xf]  ;;  %v3869_v48 = vld [vmem:[#allocation5 + $0x6c] sm:$0xf0]  ;;  %v3127_v50 = vor.u32 %v3969_v43, %v3126_v42  ;;  %1397 = vmatpush.bf16.msra.mxu1 %v2871_v45  ;;  %v2650_v42 = vld [vmem:[#allocation2] sm:$0xf] }
  0x32   :  { %v2854_v49 = vld [vmem:[#allocation5 + $0x160] sm:$0xf]  ;;  %v3901_v51 = vld [vmem:[#allocation5 + $0x16c] sm:$0xf0]  ;;  %v2727_v56 = vor.u32 %v3869_v48, %v2726_v47  ;;  %1411 = vmatpush.bf16.msra.mxu2 %v2999_v46  ;;  %v3851_v43 = vld [vmem:[#allocation2 + $0x18] sm:$0xf0] }
  0x33   :  { %v2982_v52 = vld [vmem:[#allocation5 + $0x260] sm:$0xf]  ;;  %v3933_v53 = vld [vmem:[#allocation5 + $0x26c] sm:$0xf0]  ;;  %v2855_v57 = vor.u32 %v3901_v51, %v2854_v49  ;;  %1425 = vmatpush.bf16.msra.mxu3 %v3127_v50  ;;  %v2920_v46 = vld [vmem:[#allocation5 + $0x1f0] sm:$0xf0]  ;;  %v2795_v50 = vor.u32 %v3883_v32, %v2792_v33 }
  0x34   :  { %v3110_v54 = vld [vmem:[#allocation5 + $0x360] sm:$0xf]  ;;  %v3965_v55 = vld [vmem:[#allocation5 + $0x36c] sm:$0xf0]  ;;  %v2983_v58 = vor.u32 %v3933_v53, %v2982_v52  ;;  %1384 = vmatpush.bf16.msra.mxu0 %v2727_v56  ;;  %v3849_v47 = vld [vmem:[#allocation2 + $0xc] sm:$0xf] }
  0x35   :  { %v2710_v59 = vld [vmem:[#allocation5 + $0x40] sm:$0xf]  ;;  %v3865_v60 = vld [vmem:[#allocation5 + $0x4c] sm:$0xf0]  ;;  %v3111_v62 = vor.u32 %v3965_v55, %v3110_v54  ;;  %1398 = vmatpush.bf16.msra.mxu1 %v2855_v57  ;;  %v4481_v55 = vor.u32 %v3851_v43, %v2650_v42  ;;  %v3879_v57 = vld [vmem:[#allocation5 + $0xc4] sm:$0xf] }
  0x36   :  { %v2838_v61 = vld [vmem:[#allocation5 + $0x140] sm:$0xf]  ;;  %v3897_v63 = vld [vmem:[#allocation5 + $0x14c] sm:$0xf0]  ;;  %v2711_v4 = vor.u32 %v3865_v60, %v2710_v59  ;;  %1412 = vmatpush.bf16.msra.mxu2 %v2983_v58  ;;  %v2776_v58 = vld [vmem:[#allocation5 + $0xd0] sm:$0xf0] }
  0x37   :  { %v2966_v0 = vld [vmem:[#allocation5 + $0x240] sm:$0xf]  ;;  %v3929_v1 = vld [vmem:[#allocation5 + $0x24c] sm:$0xf0]  ;;  %v2839_v6 = vor.u32 %v3897_v63, %v2838_v61  ;;  %1426 = vmatpush.bf16.msra.mxu3 %v3111_v62  ;;  %v3848_v61 = vld [vmem:[#allocation2 + $0x4] sm:$0xf]  ;;  %v2923_v63 = vor.u32 %v3915_v41, %v2920_v46 }
  0x38   :  { %v3094_v2 = vld [vmem:[#allocation5 + $0x340] sm:$0xf]  ;;  %v3961_v3 = vld [vmem:[#allocation5 + $0x34c] sm:$0xf0]  ;;  %v2967_v7 = vor.u32 %v3929_v1, %v2966_v0  ;;  %1385 = vmatpush.bf16.msra.mxu0 %v2711_v4  ;;  %v2652_v62 = vld [vmem:[#allocation2 + $0x1c] sm:$0xf0]  ;;  %v2779_v4 = vor.u32 %v3879_v57, %v2776_v58 }
  0x39   :  { %v2694_v5 = vld [vmem:[#allocation5 + $0x20] sm:$0xf]  ;;  %v3861_v8 = vld [vmem:[#allocation5 + $0x2c] sm:$0xf0]  ;;  %v3095_v11 = vor.u32 %v3961_v3, %v3094_v2  ;;  %1399 = vmatpush.bf16.msra.mxu1 %v2839_v6  ;;  %v3911_v1 = vld [vmem:[#allocation5 + $0x1c4] sm:$0xf] }
  0x3a   :  { %v2822_v9 = vld [vmem:[#allocation5 + $0x120] sm:$0xf]  ;;  %v3893_v10 = vld [vmem:[#allocation5 + $0x12c] sm:$0xf0]  ;;  %v2695_v18 = vor.u32 %v3861_v8, %v2694_v5  ;;  %1413 = vmatpush.bf16.msra.mxu2 %v2967_v7  ;;  %v2904_v2 = vld [vmem:[#allocation5 + $0x1d0] sm:$0xf0]  ;;  %v4487_v8 = vor.u32 %v3848_v61, %v2652_v62 }
  0x3b   :  { %v2950_v12 = vld [vmem:[#allocation5 + $0x220] sm:$0xf]  ;;  %v3925_v13 = vld [vmem:[#allocation5 + $0x22c] sm:$0xf0]  ;;  %v2823_v23 = vor.u32 %v3893_v10, %v2822_v9  ;;  %1427 = vmatpush.bf16.msra.mxu3 %v3095_v11  ;;  %v3875_v10 = vld [vmem:[#allocation5 + $0xa4] sm:$0xf] }
  0x3c   :  { %v3078_v14 = vld [vmem:[#allocation5 + $0x320] sm:$0xf]  ;;  %v3957_v15 = vld [vmem:[#allocation5 + $0x32c] sm:$0xf0]  ;;  %v2951_v24 = vor.u32 %v3925_v13, %v2950_v12  ;;  %1386 = vmatpush.bf16.msra.mxu0 %v2695_v18  ;;  %v2760_v11 = vld [vmem:[#allocation5 + $0xb0] sm:$0xf0]  ;;  %v2907_v12 = vor.u32 %v3911_v1, %v2904_v2 }
  0x3d   :  { %v2678_v16 = vld [vmem:[#allocation5] sm:$0xf]  ;;  %v3857_v17 = vld [vmem:[#allocation5 + $0xc] sm:$0xf0]  ;;  %v3079_v28 = vor.u32 %v3957_v15, %v3078_v14  ;;  %1400 = vmatpush.bf16.msra.mxu1 %v2823_v23  ;;  %v3907_v14 = vld [vmem:[#allocation5 + $0x1a4] sm:$0xf] }
  0x3e   :  { %v2806_v19 = vld [vmem:[#allocation5 + $0x100] sm:$0xf]  ;;  %v3889_v20 = vld [vmem:[#allocation5 + $0x10c] sm:$0xf0]  ;;  %v2679_v35 = vor.u32 %v3857_v17, %v2678_v16  ;;  %1414 = vmatpush.bf16.msra.mxu2 %v2951_v24  ;;  %v2888_v15 = vld [vmem:[#allocation5 + $0x1b0] sm:$0xf0]  ;;  %v2763_v17 = vor.u32 %v3875_v10, %v2760_v11 }
  0x3f   :  { %v2934_v21 = vld [vmem:[#allocation5 + $0x200] sm:$0xf]  ;;  %v3921_v22 = vld [vmem:[#allocation5 + $0x20c] sm:$0xf0]  ;;  %v2807_v39 = vor.u32 %v3889_v20, %v2806_v19  ;;  %1428 = vmatpush.bf16.msra.mxu3 %v3079_v28  ;;  %v2744_v23 = vld [vmem:[#allocation5 + $0x90] sm:$0xf0]  ;;  %v2891_v24 = vor.u32 %v3907_v14, %v2888_v15 }
  0x40   :  { %v3062_v25 = vld [vmem:[#allocation5 + $0x300] sm:$0xf]  ;;  %v3953_v26 = vld [vmem:[#allocation5 + $0x30c] sm:$0xf0]  ;;  %v2935_v40 = vor.u32 %v3921_v22, %v2934_v21  ;;  %1387 = vmatpush.bf16.msra.mxu0 %v2679_v35  ;;  %v3871_v22 = vld [vmem:[#allocation5 + $0x84] sm:$0xf] }
  0x41   :  { %v3302_v27 = vld [vmem:[#allocation5 + $0x4e0] sm:$0xf]  ;;  %v4013_v29 = vld [vmem:[#allocation5 + $0x4ec] sm:$0xf0]  ;;  %v3063_v44 = vor.u32 %v3953_v26, %v3062_v25  ;;  %1401 = vmatpush.bf16.msra.mxu1 %v2807_v39  ;;  %v3903_v26 = vld [vmem:[#allocation5 + $0x184] sm:$0xf] }
  0x42   :  { %v3430_v30 = vld [vmem:[#allocation5 + $0x5e0] sm:$0xf]  ;;  %v4045_v31 = vld [vmem:[#allocation5 + $0x5ec] sm:$0xf0]  ;;  %v3303_v45 = vor.u32 %v4013_v29, %v3302_v27  ;;  %1415 = vmatpush.bf16.msra.mxu2 %v2935_v40  ;;  %v2872_v27 = vld [vmem:[#allocation5 + $0x190] sm:$0xf0]  ;;  %v2747_v29 = vor.u32 %v3871_v22, %v2744_v23 }
  0x43   :  { %v2658_v34 = vld [vmem:[#allocation2 + $0x8] sm:$0xf]  ;;  %v3446_v37 = vld [vmem:[#allocation5 + $0x600] sm:$0xf]  ;;  %v3431_v49 = vor.u32 %v4045_v31, %v3430_v30  ;;  %1429 = vmatpush.bf16.msra.mxu3 %v3063_v44  ;;  %1388 = vmatmul.bf16.vlgmr.msra.gmra.mxu0 %v4481_v55  ;;  %v2728_v35 = vld [vmem:[#allocation5 + $0x70] sm:$0xf0] }
  0x44   :  { %v4049_v38 = vld [vmem:[#allocation5 + $0x60c] sm:$0xf0]  ;;  %v3286_v51 = vld [vmem:[#allocation5 + $0x4c0] sm:$0xf]  ;;  %v4479_v54 = vor.u32 %v3852_v36, %v2658_v34  ;;  %1436 = vmatpush.bf16.msrb.mxu0 %v3303_v45  ;;  %1402 = vmatmul.bf16.vlgmr.msra.gmra.mxu1 %v4487_v8  ;;  %v3867_v34 = vld [vmem:[#allocation5 + $0x64] sm:$0xf] }
  0x45   :  { %v2660_v48 = vld [vmem:[#allocation2 + $0x24] sm:$0xf0]  ;;  %v3414_v53 = vld [vmem:[#allocation5 + $0x5c0] sm:$0xf]  ;;  %v3447_v59 = vor.u32 %v4049_v38, %v3446_v37  ;;  %1450 = vmatpush.bf16.msrb.mxu1 %v3431_v49  ;;  %v3854_v37 = vld [vmem:[#allocation2 + $0x30] sm:$0xf0]  ;;  %v2875_v38 = vor.u32 %v3903_v26, %v2872_v27  ;;  %v2731_v43 = vor.u32 %v3867_v34, %v2728_v35 }
  0x46   :  { %v4009_v52 = vld [vmem:[#allocation5 + $0x4cc] sm:$0xf0]  ;;  %v4483_v60 = vor.u32 %v3849_v47, %v2660_v48  ;;  %v3270_v5 = vld [vmem:[#allocation5 + $0x4a0] sm:$0xf]  ;;  %1416 = vmatmul.bf16.vlgmr.msra.gmra.mxu2 %v4479_v54  ;;  %v3899_v40 = vld [vmem:[#allocation5 + $0x164] sm:$0xf] }
  0x47   :  { %v4041_v56 = vld [vmem:[#allocation5 + $0x5cc] sm:$0xf0]  ;;  %v3287_v0 = vor.u32 %v4009_v52, %v3286_v51  ;;  %1478 = vmatpush.bf16.msrb.mxu3 %v2795_v50  ;;  %v3398_v7 = vld [vmem:[#allocation5 + $0x5a0] sm:$0xf]  ;;  %1471 = vmatpush.bf16.msrb.mxu2 %v3447_v59  ;;  %v2856_v41 = vld [vmem:[#allocation5 + $0x170] sm:$0xf0] }
  0x48   :  { %v3415_v3 = vor.u32 %v4041_v56, %v3414_v53  ;;  %v4005_v6 = vld [vmem:[#allocation5 + $0x4ac] sm:$0xf0]  ;;  %1430 = vmatmul.bf16.vlgmr.msra.gmra.mxu3 %v4483_v60  ;;  %v3254_v18 = vld [vmem:[#allocation5 + $0x480] sm:$0xf]  ;;  %v3863_v48 = vld [vmem:[#allocation5 + $0x44] sm:$0xf]  ;;  %v2859_v51 = vor.u32 %v3899_v40, %v2856_v41 }
  0x49   :  { %v4037_v9 = vld [vmem:[#allocation5 + $0x5ac] sm:$0xf0]  ;;  %1437 = vmatpush.bf16.msrb.mxu0 %v3287_v0  ;;  %v3271_v13 = vor.u32 %v4005_v6, %v3270_v5  ;;  %v3382_v20 = vld [vmem:[#allocation5 + $0x580] sm:$0xf]  ;;  %v2712_v49 = vld [vmem:[#allocation5 + $0x50] sm:$0xf0] }
  0x4a   :  { %1451 = vmatpush.bf16.msrb.mxu1 %v3415_v3  ;;  %v3399_v16 = vor.u32 %v4037_v9, %v3398_v7  ;;  %v4001_v19 = vld [vmem:[#allocation5 + $0x48c] sm:$0xf0]  ;;  %v3238_v30 = vld [vmem:[#allocation5 + $0x460] sm:$0xf]  ;;  %v3895_v53 = vld [vmem:[#allocation5 + $0x144] sm:$0xf]  ;;  %v2715_v58 = vor.u32 %v3863_v48, %v2712_v49 }
  0x4b   :  { %1492 = vmatpush.bf16.msra.mxu2 %v2923_v63  ;;  %1479 = vmatpush.bf16.msrb.mxu3 %v2779_v4  ;;  %v4033_v21 = vld [vmem:[#allocation5 + $0x58c] sm:$0xf0]  ;;  %v3255_v25 = vor.u32 %v4001_v19, %v3254_v18  ;;  %v3366_v32 = vld [vmem:[#allocation5 + $0x560] sm:$0xf]  ;;  %v2840_v56 = vld [vmem:[#allocation5 + $0x150] sm:$0xf0] }
  0x4c   :  { %v3383_v28 = vor.u32 %v4033_v21, %v3382_v20  ;;  %v3997_v31 = vld [vmem:[#allocation5 + $0x46c] sm:$0xf0]  ;;  %v2674_v36 = vld [vmem:[#allocation2 + $0x18] sm:$0xf]  ;;  %v3859_v0 = vld [vmem:[#allocation5 + $0x24] sm:$0xf]  ;;  %v2843_v4 = vor.u32 %v3895_v53, %v2840_v56 }
  0x4d   :  { %1438 = vmatpush.bf16.msrb.mxu0 %v3271_v13  ;;  %v4029_v33 = vld [vmem:[#allocation5 + $0x56c] sm:$0xf0]  ;;  %v3239_v39 = vor.u32 %v3997_v31, %v3238_v30  ;;  %v3222_v44 = vld [vmem:[#allocation5 + $0x440] sm:$0xf]  ;;  %v4491_v50 = vor.u32 %v3854_v37, %v2674_v36  ;;  %v2696_v1 = vld [vmem:[#allocation5 + $0x30] sm:$0xf0] }
  0x4e   :  { %1452 = vmatpush.bf16.msrb.mxu1 %v3399_v16  ;;  %v3367_v42 = vor.u32 %v4029_v33, %v3366_v32  ;;  %v3993_v45 = vld [vmem:[#allocation5 + $0x44c] sm:$0xf0]  ;;  %v3350_v46 = vld [vmem:[#allocation5 + $0x540] sm:$0xf]  ;;  %v3891_v2 = vld [vmem:[#allocation5 + $0x124] sm:$0xf]  ;;  %v2699_v11 = vor.u32 %v3859_v0, %v2696_v1 }
  0x4f   :  { %1493 = vmatpush.bf16.msra.mxu2 %v2907_v12  ;;  %1480 = vmatpush.bf16.msrb.mxu3 %v2763_v17  ;;  %v4025_v47 = vld [vmem:[#allocation5 + $0x54c] sm:$0xf0]  ;;  %v3223_v52 = vor.u32 %v3993_v45, %v3222_v44  ;;  %v3206_v59 = vld [vmem:[#allocation5 + $0x420] sm:$0xf]  ;;  %v2824_v3 = vld [vmem:[#allocation5 + $0x130] sm:$0xf0] }
  0x50   :  { %v3351_v57 = vor.u32 %v4025_v47, %v3350_v46  ;;  %v3989_v61 = vld [vmem:[#allocation5 + $0x42c] sm:$0xf0]  ;;  %v3334_v62 = vld [vmem:[#allocation5 + $0x520] sm:$0xf]  ;;  %v3855_v13 = vld [vmem:[#allocation5 + $0x4] sm:$0xf]  ;;  %v2827_v21 = vor.u32 %v3891_v2, %v2824_v3 }
  0x51   :  { %1439 = vmatpush.bf16.msrb.mxu0 %v3255_v25  ;;  %v4021_v63 = vld [vmem:[#allocation5 + $0x52c] sm:$0xf0]  ;;  %v3207_v5 = vor.u32 %v3989_v61, %v3206_v59  ;;  %v3190_v6 = vld [vmem:[#allocation5 + $0x400] sm:$0xf]  ;;  %v2680_v14 = vld [vmem:[#allocation5 + $0x10] sm:$0xf0] }
  0x52   :  { %1453 = vmatpush.bf16.msrb.mxu1 %v3383_v28  ;;  %v3985_v7 = vld [vmem:[#allocation5 + $0x40c] sm:$0xf0]  ;;  %v3318_v9 = vld [vmem:[#allocation5 + $0x500] sm:$0xf]  ;;  %v3335_v10 = vor.u32 %v4021_v63, %v3334_v62  ;;  %v3947_v15 = vld [vmem:[#allocation5 + $0x2e4] sm:$0xf]  ;;  %v2683_v27 = vor.u32 %v3855_v13, %v2680_v14 }
  0x53   :  { %1494 = vmatpush.bf16.msra.mxu2 %v2891_v24  ;;  %1481 = vmatpush.bf16.msrb.mxu3 %v2747_v29  ;;  %v4017_v12 = vld [vmem:[#allocation5 + $0x50c] sm:$0xf0]  ;;  %v3048_v16 = vld [vmem:[#allocation5 + $0x2f0] sm:$0xf0]  ;;  %v3979_v17 = vld [vmem:[#allocation5 + $0x3e4] sm:$0xf]  ;;  %v3191_v22 = vor.u32 %v3985_v7, %v3190_v6 }
  0x54   :  { %v3176_v18 = vld [vmem:[#allocation5 + $0x3f0] sm:$0xf0]  ;;  %v4011_v19 = vld [vmem:[#allocation5 + $0x4e4] sm:$0xf]  ;;  %v2666_v23 = vld [vmem:[#allocation2 + $0x10] sm:$0xf]  ;;  %v3319_v26 = vor.u32 %v4017_v12, %v3318_v9  ;;  %v3051_v31 = vor.u32 %v3947_v15, %v3048_v16 }
  0x55   :  { %1440 = vmatpush.bf16.msrb.mxu0 %v3239_v39  ;;  %v3304_v20 = vld [vmem:[#allocation5 + $0x4f0] sm:$0xf0]  ;;  %v3887_v25 = vld [vmem:[#allocation5 + $0x104] sm:$0xf]  ;;  %v3850_v29 = vld [vmem:[#allocation2 + $0x14] sm:$0xf]  ;;  %v3179_v32 = vor.u32 %v3979_v17, %v3176_v18 }
  0x56   :  { %1454 = vmatpush.bf16.msrb.mxu1 %v3367_v42  ;;  %3460 = vmatmul.msk.bf16.vlgmr.msrb.gmra.mxu2 %vm1376_vm0, %v4491_v50  ;;  %v3853_v24 = vld [vmem:[#allocation2 + $0x28] sm:$0xf0]  ;;  %v2668_v30 = vld [vmem:[#allocation2 + $0x2c] sm:$0xf0]  ;;  %v4043_v33 = vld [vmem:[#allocation5 + $0x5e4] sm:$0xf]  ;;  %v3307_v36 = vor.u32 %v4011_v19, %v3304_v20 }
  0x57   :  { %1495 = vmatpush.bf16.msra.mxu2 %v2875_v38  ;;  %1482 = vmatpush.bf16.msrb.mxu3 %v2731_v43  ;;  %v2808_v28 = vld [vmem:[#allocation5 + $0x110] sm:$0xf0]  ;;  %v3943_v35 = vld [vmem:[#allocation5 + $0x2c4] sm:$0xf]  ;;  %v4495_v37 = vor.u32 %v3853_v24, %v2666_v23  ;;  %v4497_v42 = vor.u32 %v3850_v29, %v2668_v30 }
  0x58   :  { %v3432_v34 = vld [vmem:[#allocation5 + $0x5f0] sm:$0xf0]  ;;  %v3975_v39 = vld [vmem:[#allocation5 + $0x3c4] sm:$0xf]  ;;  %v2811_v41 = vor.u32 %v3887_v25, %v2808_v28 }
  0x59   :  { %1441 = vmatpush.bf16.msrb.mxu0 %v3223_v52  ;;  %v3032_v38 = vld [vmem:[#allocation5 + $0x2d0] sm:$0xf0]  ;;  %v4007_v43 = vld [vmem:[#allocation5 + $0x4c4] sm:$0xf]  ;;  %v3435_v45 = vor.u32 %v4043_v33, %v3432_v34 }
  0x5a   :  { %1455 = vmatpush.bf16.msrb.mxu1 %v3351_v57  ;;  %v3160_v40 = vld [vmem:[#allocation5 + $0x3d0] sm:$0xf0]  ;;  %v3035_v46 = vor.u32 %v3943_v35, %v3032_v38  ;;  %v4039_v48 = vld [vmem:[#allocation5 + $0x5c4] sm:$0xf] }
  0x5b   :  { %1496 = vmatpush.bf16.msra.mxu2 %v2859_v51  ;;  %1483 = vmatpush.bf16.msrb.mxu3 %v2715_v58  ;;  %v3288_v44 = vld [vmem:[#allocation5 + $0x4d0] sm:$0xf0]  ;;  %v3163_v47 = vor.u32 %v3975_v39, %v3160_v40  ;;  %v3939_v51 = vld [vmem:[#allocation5 + $0x2a4] sm:$0xf] }
  0x5c   :  { %v3416_v49 = vld [vmem:[#allocation5 + $0x5d0] sm:$0xf0]  ;;  %v3291_v52 = vor.u32 %v4007_v43, %v3288_v44  ;;  %v3971_v56 = vld [vmem:[#allocation5 + $0x3a4] sm:$0xf] }
  0x5d   :  { %1442 = vmatpush.bf16.msrb.mxu0 %v3207_v5  ;;  %v3016_v53 = vld [vmem:[#allocation5 + $0x2b0] sm:$0xf0]  ;;  %v4003_v58 = vld [vmem:[#allocation5 + $0x4a4] sm:$0xf]  ;;  %v3419_v61 = vor.u32 %v4039_v48, %v3416_v49 }
  0x5e   :  { %1456 = vmatpush.bf16.msrb.mxu1 %v3335_v10  ;;  %v3144_v57 = vld [vmem:[#allocation5 + $0x3b0] sm:$0xf0]  ;;  %v3019_v62 = vor.u32 %v3939_v51, %v3016_v53  ;;  %v4035_v0 = vld [vmem:[#allocation5 + $0x5a4] sm:$0xf] }
  0x5f   :  { %1497 = vmatpush.bf16.msra.mxu2 %v2843_v4  ;;  %1484 = vmatpush.bf16.msrb.mxu3 %v2699_v11  ;;  %v3272_v59 = vld [vmem:[#allocation5 + $0x4b0] sm:$0xf0]  ;;  %v3147_v63 = vor.u32 %v3971_v56, %v3144_v57  ;;  %v3935_v2 = vld [vmem:[#allocation5 + $0x284] sm:$0xf] }
  0x60   :  { %v3400_v1 = vld [vmem:[#allocation5 + $0x5b0] sm:$0xf0]  ;;  %v3275_v3 = vor.u32 %v4003_v58, %v3272_v59  ;;  %v3967_v5 = vld [vmem:[#allocation5 + $0x384] sm:$0xf] }
  0x61   :  { %1443 = vmatpush.bf16.msrb.mxu0 %v3191_v22  ;;  %v3000_v4 = vld [vmem:[#allocation5 + $0x290] sm:$0xf0]  ;;  %v3999_v7 = vld [vmem:[#allocation5 + $0x484] sm:$0xf]  ;;  %v3403_v10 = vor.u32 %v4035_v0, %v3400_v1  ;;  %v2798_v0 = vld [vmem:[#allocation5 + $0xe8] sm:$0xf] }
  0x62   :  { %1457 = vmatpush.bf16.msrb.mxu1 %v3319_v26  ;;  %v3128_v6 = vld [vmem:[#allocation5 + $0x390] sm:$0xf0]  ;;  %v3003_v11 = vor.u32 %v3935_v2, %v3000_v4  ;;  %v4031_v13 = vld [vmem:[#allocation5 + $0x584] sm:$0xf]  ;;  %v3886_v1 = vld [vmem:[#allocation5 + $0xf4] sm:$0xf0] }
  0x63   :  { %1498 = vmatpush.bf16.msra.mxu2 %v2827_v21  ;;  %1485 = vmatpush.bf16.msrb.mxu3 %v2683_v27  ;;  %v3256_v9 = vld [vmem:[#allocation5 + $0x490] sm:$0xf0]  ;;  %v3131_v12 = vor.u32 %v3967_v5, %v3128_v6  ;;  %v3931_v15 = vld [vmem:[#allocation5 + $0x264] sm:$0xf]  ;;  %v3054_v5 = vld [vmem:[#allocation5 + $0x2e8] sm:$0xf] }
  0x64   :  { %1444 = vmatmul.bf16.vlgmr.msrb.gmra.mxu0 %v4495_v37  ;;  %v3384_v14 = vld [vmem:[#allocation5 + $0x590] sm:$0xf0]  ;;  %v3259_v16 = vor.u32 %v3999_v7, %v3256_v9  ;;  %v3963_v18 = vld [vmem:[#allocation5 + $0x364] sm:$0xf]  ;;  %v3950_v6 = vld [vmem:[#allocation5 + $0x2f4] sm:$0xf0] }
  0x65   :  { %1506 = vmatpush.bf16.msra.mxu0 %v3051_v31  ;;  %1458 = vmatmul.bf16.vlgmr.msrb.gmra.mxu1 %v4497_v42  ;;  %v2984_v17 = vld [vmem:[#allocation5 + $0x270] sm:$0xf0]  ;;  %v3995_v20 = vld [vmem:[#allocation5 + $0x464] sm:$0xf]  ;;  %v3387_v22 = vor.u32 %v4031_v13, %v3384_v14  ;;  %v2799_v13 = vor.u32 %v3886_v1, %v2798_v0  ;;  %v3182_v14 = vld [vmem:[#allocation5 + $0x3e8] sm:$0xf] }
  0x66   :  { %1520 = vmatpush.bf16.msra.mxu1 %v3179_v32  ;;  %1486 = vmatmul.bf16.vlgmr.msrb.gmra.mxu3 %v4481_v55  ;;  %v3112_v19 = vld [vmem:[#allocation5 + $0x370] sm:$0xf0]  ;;  %v2987_v23 = vor.u32 %v3931_v15, %v2984_v17  ;;  %v4027_v25 = vld [vmem:[#allocation5 + $0x564] sm:$0xf]  ;;  %v3982_v15 = vld [vmem:[#allocation5 + $0x3f4] sm:$0xf0] }
  0x67   :  { %1534 = vmatpush.bf16.msra.mxu3 %v3307_v36  ;;  %1499 = vmatpush.bf16.msra.mxu2 %v2811_v41  ;;  %v3240_v21 = vld [vmem:[#allocation5 + $0x470] sm:$0xf0]  ;;  %v3115_v24 = vor.u32 %v3963_v18, %v3112_v19  ;;  %v3927_v27 = vld [vmem:[#allocation5 + $0x244] sm:$0xf]  ;;  %v2926_v17 = vld [vmem:[#allocation5 + $0x1e8] sm:$0xf]  ;;  %v3055_v19 = vor.u32 %v3950_v6, %v3054_v5 }
  0x68   :  { %v3368_v26 = vld [vmem:[#allocation5 + $0x570] sm:$0xf0]  ;;  %v3243_v28 = vor.u32 %v3995_v20, %v3240_v21  ;;  %v3959_v30 = vld [vmem:[#allocation5 + $0x344] sm:$0xf]  ;;  %v3918_v18 = vld [vmem:[#allocation5 + $0x1f4] sm:$0xf0] }
  0x69   :  { %1507 = vmatpush.bf16.msra.mxu0 %v3035_v46  ;;  %v2968_v29 = vld [vmem:[#allocation5 + $0x250] sm:$0xf0]  ;;  %v3991_v32 = vld [vmem:[#allocation5 + $0x444] sm:$0xf]  ;;  %v3371_v34 = vor.u32 %v4027_v25, %v3368_v26  ;;  %v2782_v21 = vld [vmem:[#allocation5 + $0xc8] sm:$0xf]  ;;  %v2927_v26 = vor.u32 %v3918_v18, %v2926_v17 }
  0x6a   :  { %1521 = vmatpush.bf16.msra.mxu1 %v3163_v47  ;;  %1500 = vmatmul.bf16.vlgmr.msra.gmra.mxu2 %v4487_v8  ;;  %v3096_v31 = vld [vmem:[#allocation5 + $0x350] sm:$0xf0]  ;;  %v2971_v35 = vor.u32 %v3927_v27, %v2968_v29  ;;  %v4023_v38 = vld [vmem:[#allocation5 + $0x544] sm:$0xf]  ;;  %v3946_v25 = vld [vmem:[#allocation5 + $0x2d4] sm:$0xf0] }
  0x6b   :  { %1548 = vmatpush.bf16.msrb.mxu2 %v3435_v45  ;;  %1535 = vmatpush.bf16.msra.mxu3 %v3291_v52  ;;  %v3224_v33 = vld [vmem:[#allocation5 + $0x450] sm:$0xf0]  ;;  %v3099_v36 = vor.u32 %v3959_v30, %v3096_v31  ;;  %v3923_v40 = vld [vmem:[#allocation5 + $0x224] sm:$0xf]  ;;  %v3166_v27 = vld [vmem:[#allocation5 + $0x3c8] sm:$0xf] }
  0x6c   :  { %v3352_v39 = vld [vmem:[#allocation5 + $0x550] sm:$0xf0]  ;;  %v3227_v41 = vor.u32 %v3991_v32, %v3224_v33  ;;  %v3955_v44 = vld [vmem:[#allocation5 + $0x324] sm:$0xf]  ;;  %v2910_v30 = vld [vmem:[#allocation5 + $0x1c8] sm:$0xf] }
  0x6d   :  { %1508 = vmatpush.bf16.msra.mxu0 %v3019_v62  ;;  %v2952_v43 = vld [vmem:[#allocation5 + $0x230] sm:$0xf0]  ;;  %v3987_v46 = vld [vmem:[#allocation5 + $0x424] sm:$0xf]  ;;  %v3355_v48 = vor.u32 %v4023_v38, %v3352_v39  ;;  %v3914_v31 = vld [vmem:[#allocation5 + $0x1d4] sm:$0xf0] }
  0x6e   :  { %1522 = vmatpush.bf16.msra.mxu1 %v3147_v63  ;;  %v3080_v45 = vld [vmem:[#allocation5 + $0x330] sm:$0xf0]  ;;  %v4019_v49 = vld [vmem:[#allocation5 + $0x524] sm:$0xf]  ;;  %v2955_v52 = vor.u32 %v3923_v40, %v2952_v43  ;;  %v2766_v33 = vld [vmem:[#allocation5 + $0xa8] sm:$0xf]  ;;  %v2911_v39 = vor.u32 %v3914_v31, %v2910_v30 }
  0x6f   :  { %1549 = vmatpush.bf16.msrb.mxu2 %v3419_v61  ;;  %1536 = vmatpush.bf16.msra.mxu3 %v3275_v3  ;;  %v3208_v47 = vld [vmem:[#allocation5 + $0x430] sm:$0xf0]  ;;  %v3083_v53 = vor.u32 %v3955_v44, %v3080_v45  ;;  %v3919_v56 = vld [vmem:[#allocation5 + $0x204] sm:$0xf]  ;;  %v3942_v38 = vld [vmem:[#allocation5 + $0x2b4] sm:$0xf0] }
  0x70   :  { %v3336_v51 = vld [vmem:[#allocation5 + $0x530] sm:$0xf0]  ;;  %v3951_v58 = vld [vmem:[#allocation5 + $0x304] sm:$0xf]  ;;  %v3211_v59 = vor.u32 %v3987_v46, %v3208_v47  ;;  %v3150_v40 = vld [vmem:[#allocation5 + $0x3a8] sm:$0xf] }
  0x71   :  { %1509 = vmatpush.bf16.msra.mxu0 %v3003_v11  ;;  %v2936_v57 = vld [vmem:[#allocation5 + $0x210] sm:$0xf0]  ;;  %v3983_v62 = vld [vmem:[#allocation5 + $0x404] sm:$0xf]  ;;  %v3339_v3 = vor.u32 %v4019_v49, %v3336_v51  ;;  %v2894_v44 = vld [vmem:[#allocation5 + $0x1a8] sm:$0xf] }
  0x72   :  { %1523 = vmatpush.bf16.msra.mxu1 %v3131_v12  ;;  %v3064_v61 = vld [vmem:[#allocation5 + $0x310] sm:$0xf0]  ;;  %v4047_v2 = vld [vmem:[#allocation5 + $0x604] sm:$0xf]  ;;  %v2939_v7 = vor.u32 %v3919_v56, %v2936_v57  ;;  %v3910_v45 = vld [vmem:[#allocation5 + $0x1b4] sm:$0xf0] }
  0x73   :  { %1550 = vmatpush.bf16.msrb.mxu2 %v3403_v10  ;;  %1537 = vmatpush.bf16.msra.mxu3 %v3259_v16  ;;  %v3192_v63 = vld [vmem:[#allocation5 + $0x410] sm:$0xf0]  ;;  %v3067_v9 = vor.u32 %v3951_v58, %v3064_v61  ;;  %v4015_v10 = vld [vmem:[#allocation5 + $0x504] sm:$0xf]  ;;  %v2750_v47 = vld [vmem:[#allocation5 + $0x88] sm:$0xf]  ;;  %v2895_v56 = vor.u32 %v3910_v45, %v2894_v44 }
  0x74   :  { %v3448_v4 = vld [vmem:[#allocation5 + $0x610] sm:$0xf0]  ;;  %v3195_v12 = vor.u32 %v3983_v62, %v3192_v63  ;;  %v3006_v51 = vld [vmem:[#allocation5 + $0x288] sm:$0xf]  ;;  %v3970_v57 = vld [vmem:[#allocation5 + $0x394] sm:$0xf0] }
  0x75   :  { %1510 = vmatpush.bf16.msra.mxu0 %v2987_v23  ;;  %v3320_v11 = vld [vmem:[#allocation5 + $0x510] sm:$0xf0]  ;;  %v3451_v16 = vor.u32 %v4047_v2, %v3448_v4  ;;  %v3183_v23 = vor.u32 %v3982_v15, %v3182_v14  ;;  %v3906_v61 = vld [vmem:[#allocation5 + $0x194] sm:$0xf0]  ;;  %v2734_v63 = vld [vmem:[#allocation5 + $0x68] sm:$0xf] }
  0x76   :  { %1524 = vmatpush.bf16.msra.mxu1 %v3115_v24  ;;  %v3323_v20 = vor.u32 %v4015_v10, %v3320_v11  ;;  %v3038_v24 = vld [vmem:[#allocation5 + $0x2c8] sm:$0xf]  ;;  %v3870_v0 = vld [vmem:[#allocation5 + $0x74] sm:$0xf0] }
  0x77   :  { %1551 = vmatpush.bf16.msrb.mxu2 %v3387_v22  ;;  %1538 = vmatpush.bf16.msra.mxu3 %v3243_v28  ;;  %v3882_v22 = vld [vmem:[#allocation5 + $0xd4] sm:$0xf0]  ;;  %v3039_v32 = vor.u32 %v3946_v25, %v3038_v24  ;;  %v2990_v2 = vld [vmem:[#allocation5 + $0x268] sm:$0xf] }
  0x78   :  { %v3978_v28 = vld [vmem:[#allocation5 + $0x3d4] sm:$0xf0]  ;;  %v2783_v29 = vor.u32 %v3882_v22, %v2782_v21  ;;  %v3118_v5 = vld [vmem:[#allocation5 + $0x368] sm:$0xf] }
  0x79   :  { %1511 = vmatpush.bf16.msra.mxu0 %v2971_v35  ;;  %v3167_v35 = vor.u32 %v3978_v28, %v3166_v27  ;;  %v3966_v6 = vld [vmem:[#allocation5 + $0x374] sm:$0xf0]  ;;  %v2974_v15 = vld [vmem:[#allocation5 + $0x248] sm:$0xf] }
  0x7a   :  { %1525 = vmatpush.bf16.msra.mxu1 %v3099_v36  ;;  %v3022_v36 = vld [vmem:[#allocation5 + $0x2a8] sm:$0xf]  ;;  %v3902_v10 = vld [vmem:[#allocation5 + $0x174] sm:$0xf0]  ;;  %v3119_v14 = vor.u32 %v3966_v6, %v3118_v5 }
  0x7b   :  { %1552 = vmatpush.bf16.msrb.mxu2 %v3371_v34  ;;  %1539 = vmatpush.bf16.msra.mxu3 %v3227_v41  ;;  %v3878_v34 = vld [vmem:[#allocation5 + $0xb4] sm:$0xf0]  ;;  %v3023_v46 = vor.u32 %v3942_v38, %v3022_v36  ;;  %v3102_v18 = vld [vmem:[#allocation5 + $0x348] sm:$0xf] }
  0x7c   :  { %v3974_v41 = vld [vmem:[#allocation5 + $0x3b4] sm:$0xf0]  ;;  %v2767_v43 = vor.u32 %v3878_v34, %v2766_v33  ;;  %v2846_v21 = vld [vmem:[#allocation5 + $0x148] sm:$0xf] }
  0x7d   :  { %1512 = vmatpush.bf16.msra.mxu0 %v2955_v52  ;;  %v3151_v49 = vor.u32 %v3974_v41, %v3150_v40  ;;  %v3938_v52 = vld [vmem:[#allocation5 + $0x294] sm:$0xf0]  ;;  %v2702_v24 = vld [vmem:[#allocation5 + $0x28] sm:$0xf] }
  0x7e   :  { %1526 = vmatpush.bf16.msra.mxu1 %v3083_v53  ;;  %v3134_v53 = vld [vmem:[#allocation5 + $0x388] sm:$0xf]  ;;  %v3007_v62 = vor.u32 %v3938_v52, %v3006_v51  ;;  %v3898_v22 = vld [vmem:[#allocation5 + $0x154] sm:$0xf0] }
  0x7f   :  { %1553 = vmatpush.bf16.msrb.mxu2 %v3355_v48  ;;  %1540 = vmatpush.bf16.msra.mxu3 %v3211_v59  ;;  %v3874_v48 = vld [vmem:[#allocation5 + $0x94] sm:$0xf0]  ;;  %v2878_v59 = vld [vmem:[#allocation5 + $0x188] sm:$0xf]  ;;  %v3135_v1 = vor.u32 %v3970_v57, %v3134_v53  ;;  %v2800_v57 = vld [vmem:[#allocation5 + $0xf8] sm:$0xf0] }
  0x80   :  { %v2751_v58 = vor.u32 %v3874_v48, %v2750_v47  ;;  %v2879_v4 = vor.u32 %v3906_v61, %v2878_v59  ;;  %v3862_v25 = vld [vmem:[#allocation5 + $0x34] sm:$0xf0]  ;;  %v2958_v27 = vld [vmem:[#allocation5 + $0x228] sm:$0xf] }
  0x81   :  { %1513 = vmatpush.bf16.msra.mxu0 %v2939_v7  ;;  %v2735_v7 = vor.u32 %v3870_v0, %v2734_v63  ;;  %v3926_v28 = vld [vmem:[#allocation5 + $0x234] sm:$0xf0]  ;;  %v3086_v30 = vld [vmem:[#allocation5 + $0x328] sm:$0xf] }
  0x82   :  { %1527 = vmatpush.bf16.msra.mxu1 %v3067_v9  ;;  %v2862_v9 = vld [vmem:[#allocation5 + $0x168] sm:$0xf]  ;;  %v3958_v31 = vld [vmem:[#allocation5 + $0x334] sm:$0xf0]  ;;  %v2959_v36 = vor.u32 %v3926_v28, %v2958_v27 }
  0x83   :  { %1554 = vmatpush.bf16.msrb.mxu2 %v3339_v3  ;;  %1541 = vmatpush.bf16.msra.mxu3 %v3195_v12  ;;  %v3934_v3 = vld [vmem:[#allocation5 + $0x274] sm:$0xf0]  ;;  %v2718_v12 = vld [vmem:[#allocation5 + $0x48] sm:$0xf]  ;;  %v2863_v17 = vor.u32 %v3902_v10, %v2862_v9  ;;  %v3087_v41 = vor.u32 %v3958_v31, %v3086_v30  ;;  %v3880_v9 = vld [vmem:[#allocation5 + $0xcc] sm:$0xf] }
  0x84   :  { %1514 = vmatmul.bf16.vlgmr.msra.gmra.mxu0 %v4479_v54  ;;  %v2991_v11 = vor.u32 %v3934_v3, %v2990_v2  ;;  %v2830_v33 = vld [vmem:[#allocation5 + $0x128] sm:$0xf]  ;;  %v3894_v34 = vld [vmem:[#allocation5 + $0x134] sm:$0xf0]  ;;  %v3916_v3 = vld [vmem:[#allocation5 + $0x1ec] sm:$0xf] }
  0x85   :  { %1604 = vmatpush.bf16.msrb.mxu0 %v3055_v19  ;;  %1528 = vmatmul.bf16.vlgmr.msra.gmra.mxu1 %v4483_v60  ;;  %v3962_v19 = vld [vmem:[#allocation5 + $0x354] sm:$0xf0]  ;;  %v2942_v44 = vld [vmem:[#allocation5 + $0x208] sm:$0xf]  ;;  %v2831_v47 = vor.u32 %v3894_v34, %v2830_v33  ;;  %v2784_v10 = vld [vmem:[#allocation5 + $0xd8] sm:$0xf0] }
  0x86   :  { %1576 = vmatpush.bf16.msrb.mxu1 %v2799_v13  ;;  %1542 = vmatmul.bf16.vlgmr.msra.gmra.mxu3 %v4495_v37  ;;  %v3866_v13 = vld [vmem:[#allocation5 + $0x54] sm:$0xf0]  ;;  %v3438_v61 = vld [vmem:[#allocation5 + $0x5e8] sm:$0xf]  ;;  %v2896_v30 = vld [vmem:[#allocation5 + $0x1b8] sm:$0xf0] }
  0x87   :  { %1569 = vmatpush.bf16.msrb.mxu3 %v3451_v16  ;;  %1555 = vmatpush.bf16.msrb.mxu2 %v3323_v20  ;;  %v3930_v16 = vld [vmem:[#allocation5 + $0x254] sm:$0xf0]  ;;  %v2719_v20 = vor.u32 %v3866_v13, %v2718_v12  ;;  %v3294_v63 = vld [vmem:[#allocation5 + $0x4c8] sm:$0xf]  ;;  %v3872_v33 = vld [vmem:[#allocation5 + $0x8c] sm:$0xf] }
  0x88   :  { %v3858_v38 = vld [vmem:[#allocation5 + $0x14] sm:$0xf0]  ;;  %v3422_v13 = vld [vmem:[#allocation5 + $0x5c8] sm:$0xf]  ;;  %v2752_v34 = vld [vmem:[#allocation5 + $0x98] sm:$0xf0] }
  0x89   :  { %1605 = vmatpush.bf16.msrb.mxu0 %v3039_v32  ;;  %v2703_v32 = vor.u32 %v3862_v25, %v2702_v24  ;;  %v4014_v40 = vld [vmem:[#allocation5 + $0x4f4] sm:$0xf0]  ;;  %v3406_v25 = vld [vmem:[#allocation5 + $0x5a8] sm:$0xf] }
  0x8a   :  { %1577 = vmatpush.bf16.msrb.mxu1 %v2783_v29  ;;  %1556 = vmatmul.bf16.vlgmr.msrb.gmra.mxu2 %v4497_v42  ;;  %v2847_v29 = vor.u32 %v3898_v22, %v2846_v21  ;;  %v3922_v45 = vld [vmem:[#allocation5 + $0x214] sm:$0xf0]  ;;  %v3876_v21 = vld [vmem:[#allocation5 + $0xac] sm:$0xf]  ;;  %v2768_v22 = vld [vmem:[#allocation5 + $0xb8] sm:$0xf0] }
  0x8b   :  { %1618 = vmatpush.bf16.msra.mxu2 %v3183_v23  ;;  %1590 = vmatpush.bf16.msra.mxu3 %v2927_v26  ;;  %v2975_v23 = vor.u32 %v3930_v16, %v2974_v15  ;;  %v3103_v26 = vor.u32 %v3962_v19, %v3102_v18  ;;  %v3954_v48 = vld [vmem:[#allocation5 + $0x314] sm:$0xf0]  ;;  %v2943_v59 = vor.u32 %v3922_v45, %v2942_v44  ;;  %v3278_v15 = vld [vmem:[#allocation5 + $0x4a8] sm:$0xf]  ;;  %v2912_v18 = vld [vmem:[#allocation5 + $0x1d8] sm:$0xf0] }
  0x8c   :  { %v4050_v51 = vld [vmem:[#allocation5 + $0x614] sm:$0xf0]  ;;  %v2787_v19 = vor.u32 %v3880_v9, %v2784_v10  ;;  %v3262_v27 = vld [vmem:[#allocation5 + $0x488] sm:$0xf]  ;;  %v2771_v31 = vor.u32 %v3876_v21, %v2768_v22  ;;  %v2880_v44 = vld [vmem:[#allocation5 + $0x198] sm:$0xf0]  ;;  %v2755_v45 = vor.u32 %v3872_v33, %v2752_v34 }
  0x8d   :  { %1606 = vmatpush.bf16.msrb.mxu0 %v3023_v46  ;;  %v3070_v46 = vld [vmem:[#allocation5 + $0x308] sm:$0xf]  ;;  %v3890_v53 = vld [vmem:[#allocation5 + $0x114] sm:$0xf0]  ;;  %v2848_v9 = vld [vmem:[#allocation5 + $0x158] sm:$0xf0] }
  0x8e   :  { %1578 = vmatpush.bf16.msrb.mxu1 %v2767_v43  ;;  %v2814_v43 = vld [vmem:[#allocation5 + $0x108] sm:$0xf]  ;;  %v3071_v0 = vor.u32 %v3954_v48, %v3070_v46  ;;  %v4006_v16 = vld [vmem:[#allocation5 + $0x4b4] sm:$0xf0]  ;;  %v2736_v48 = vld [vmem:[#allocation5 + $0x78] sm:$0xf0] }
  0x8f   :  { %1619 = vmatpush.bf16.msra.mxu2 %v3167_v35  ;;  %1591 = vmatpush.bf16.msra.mxu3 %v2911_v39  ;;  %v2686_v35 = vld [vmem:[#allocation5 + $0x8] sm:$0xf]  ;;  %v2815_v5 = vor.u32 %v3890_v53, %v2814_v43  ;;  %v4002_v28 = vld [vmem:[#allocation5 + $0x494] sm:$0xf0]  ;;  %v3904_v43 = vld [vmem:[#allocation5 + $0x18c] sm:$0xf] }
  0x90   :  { %v3310_v39 = vld [vmem:[#allocation5 + $0x4e8] sm:$0xf]  ;;  %v2687_v52 = vor.u32 %v3858_v38, %v2686_v35  ;;  %v3263_v35 = vor.u32 %v4002_v28, %v3262_v27  ;;  %v4030_v53 = vld [vmem:[#allocation5 + $0x574] sm:$0xf0]  ;;  %v2832_v21 = vld [vmem:[#allocation5 + $0x138] sm:$0xf0] }
  0x91   :  { %1607 = vmatpush.bf16.msrb.mxu0 %v3007_v62  ;;  %v4046_v62 = vld [vmem:[#allocation5 + $0x5f4] sm:$0xf0]  ;;  %v3390_v38 = vld [vmem:[#allocation5 + $0x588] sm:$0xf]  ;;  %v3856_v27 = vld [vmem:[#allocation5 + $0xc] sm:$0xf] }
  0x92   :  { %1579 = vmatpush.bf16.msrb.mxu1 %v2751_v58  ;;  %v3311_v58 = vor.u32 %v4014_v40, %v3310_v39  ;;  %v4034_v39 = vld [vmem:[#allocation5 + $0x594] sm:$0xf0]  ;;  %v3246_v40 = vld [vmem:[#allocation5 + $0x468] sm:$0xf]  ;;  %v2688_v28 = vld [vmem:[#allocation5 + $0x18] sm:$0xf0] }
  0x93   :  { %1620 = vmatpush.bf16.msra.mxu2 %v3151_v49  ;;  %1592 = vmatpush.bf16.msra.mxu3 %v2895_v56  ;;  %v3454_v49 = vld [vmem:[#allocation5 + $0x608] sm:$0xf]  ;;  %v3884_v56 = vld [vmem:[#allocation5 + $0xec] sm:$0xf]  ;;  %v3391_v46 = vor.u32 %v4034_v39, %v3390_v38  ;;  %v3184_v33 = vld [vmem:[#allocation5 + $0x3f8] sm:$0xf0]  ;;  %v2691_v39 = vor.u32 %v3856_v27, %v2688_v28 }
  0x94   :  { %v3455_v2 = vor.u32 %v4050_v51, %v3454_v49  ;;  %v2803_v6 = vor.u32 %v3884_v56, %v2800_v57  ;;  %v2883_v51 = vor.u32 %v3904_v43, %v2880_v44  ;;  %v3230_v56 = vld [vmem:[#allocation5 + $0x448] sm:$0xf]  ;;  %v3994_v57 = vld [vmem:[#allocation5 + $0x454] sm:$0xf0]  ;;  %v3944_v38 = vld [vmem:[#allocation5 + $0x2cc] sm:$0xf] }
  0x95   :  { %1608 = vmatpush.bf16.msrb.mxu0 %v2991_v11  ;;  %v2816_v43 = vld [vmem:[#allocation5 + $0x118] sm:$0xf0] }
  0x96   :  { %1580 = vmatpush.bf16.msrb.mxu1 %v2735_v7  ;;  %3461 = vmatmul.msk.bf16.vlgmr.msrb.gmra.mxu3 %vm1376_vm0, %v4491_v50  ;;  %v3439_v7 = vor.u32 %v4046_v62, %v3438_v61  ;;  %v3120_v28 = vld [vmem:[#allocation5 + $0x378] sm:$0xf0] }
  0x97   :  { %1621 = vmatpush.bf16.msra.mxu2 %v3135_v1  ;;  %1593 = vmatpush.bf16.msra.mxu3 %v2879_v4  ;;  %v4010_v1 = vld [vmem:[#allocation5 + $0x4d4] sm:$0xf0]  ;;  %v2928_v4 = vld [vmem:[#allocation5 + $0x1f8] sm:$0xf0] }
  0x98   :  { %v3295_v11 = vor.u32 %v4010_v1, %v3294_v63  ;;  %v2931_v12 = vor.u32 %v3916_v3, %v2928_v4  ;;  %v3864_v63 = vld [vmem:[#allocation5 + $0x4c] sm:$0xf]  ;;  %v3231_v1 = vor.u32 %v3994_v57, %v3230_v56  ;;  %v3358_v3 = vld [vmem:[#allocation5 + $0x548] sm:$0xf]  ;;  %v4026_v4 = vld [vmem:[#allocation5 + $0x554] sm:$0xf0] }
  0x99   :  { %1609 = vmatpush.bf16.msrb.mxu0 %v2975_v23  ;;  %v3279_v23 = vor.u32 %v4006_v16, %v3278_v15  ;;  %v3342_v16 = vld [vmem:[#allocation5 + $0x528] sm:$0xf]  ;;  %v4008_v56 = vld [vmem:[#allocation5 + $0x4cc] sm:$0xf]  ;;  %v3296_v57 = vld [vmem:[#allocation5 + $0x4d8] sm:$0xf0] }
  0x9a   :  { %1581 = vmatpush.bf16.msrb.mxu1 %v2719_v20 }
  0x9b   :  { %1622 = vmatpush.bf16.msra.mxu2 %v3119_v14  ;;  %1594 = vmatpush.bf16.msra.mxu3 %v2863_v17  ;;  %v4042_v14 = vld [vmem:[#allocation5 + $0x5d4] sm:$0xf0]  ;;  %v3912_v17 = vld [vmem:[#allocation5 + $0x1cc] sm:$0xf] }
  0x9c   :  { %v3423_v20 = vor.u32 %v4042_v14, %v3422_v13  ;;  %v2915_v24 = vor.u32 %v3912_v17, %v2912_v18  ;;  %v2704_v13 = vld [vmem:[#allocation5 + $0x38] sm:$0xf0]  ;;  %v4022_v17 = vld [vmem:[#allocation5 + $0x534] sm:$0xf0]  ;;  %v3198_v18 = vld [vmem:[#allocation5 + $0x408] sm:$0xf] }
  0x9d   :  { %1610 = vmatpush.bf16.msrb.mxu0 %v2959_v36 }
  0x9e   :  { %1582 = vmatpush.bf16.msrb.mxu1 %v2703_v32 }
  0x9f   :  { %1623 = vmatpush.bf16.msra.mxu2 %v3103_v26  ;;  %1595 = vmatpush.bf16.msra.mxu3 %v2847_v29  ;;  %v4038_v26 = vld [vmem:[#allocation5 + $0x5b4] sm:$0xf0]  ;;  %v3908_v29 = vld [vmem:[#allocation5 + $0x1ac] sm:$0xf] }
  0xa0   :  { %v3407_v32 = vor.u32 %v4038_v26, %v3406_v25  ;;  %v2899_v36 = vor.u32 %v3908_v29, %v2896_v30  ;;  %v3343_v25 = vor.u32 %v4022_v17, %v3342_v16  ;;  %v3326_v26 = vld [vmem:[#allocation5 + $0x508] sm:$0xf]  ;;  %v3136_v17 = vld [vmem:[#allocation5 + $0x398] sm:$0xf0] }
  0xa1   :  { %1611 = vmatpush.bf16.msrb.mxu0 %v2943_v59  ;;  %v2864_v59 = vld [vmem:[#allocation5 + $0x178] sm:$0xf0] }
  0xa2   :  { %1583 = vmatpush.bf16.msrb.mxu1 %v2687_v52  ;;  %v3374_v52 = vld [vmem:[#allocation5 + $0x568] sm:$0xf] }
  0xa3   :  { %1624 = vmatpush.bf16.msra.mxu2 %v3087_v41  ;;  %1596 = vmatpush.bf16.msra.mxu3 %v2831_v47  ;;  %v3998_v41 = vld [vmem:[#allocation5 + $0x474] sm:$0xf0]  ;;  %v3868_v47 = vld [vmem:[#allocation5 + $0x6c] sm:$0xf]  ;;  %v3375_v62 = vor.u32 %v4030_v53, %v3374_v52  ;;  %v3168_v53 = vld [vmem:[#allocation5 + $0x3d8] sm:$0xf0] }
  0xa4   :  { %1612 = vmatmul.bf16.vlgmr.msrb.gmra.mxu0 %v4479_v54  ;;  %v3247_v49 = vor.u32 %v3998_v41, %v3246_v40  ;;  %v2739_v61 = vor.u32 %v3868_v47, %v2736_v48  ;;  %v3040_v40 = vld [vmem:[#allocation5 + $0x2d8] sm:$0xf0]  ;;  %v3888_v41 = vld [vmem:[#allocation5 + $0x10c] sm:$0xf] }
  0xa5   :  { %1667 = vmatpush.bf16.msra.mxu0 %v3455_v2  ;;  %1584 = vmatmul.bf16.vlgmr.msrb.gmra.mxu1 %v4481_v55  ;;  %v2819_v52 = vor.u32 %v3888_v41, %v2816_v43  ;;  %v3992_v41 = vld [vmem:[#allocation5 + $0x44c] sm:$0xf]  ;;  %v3232_v43 = vld [vmem:[#allocation5 + $0x458] sm:$0xf0] }
  0xa6   :  { %1632 = vmatpush.bf16.msra.mxu1 %v3311_v58  ;;  %v3900_v58 = vld [vmem:[#allocation5 + $0x16c] sm:$0xf] }
  0xa7   :  { %1625 = vmatpush.bf16.msra.mxu2 %v3071_v0  ;;  %1597 = vmatpush.bf16.msra.mxu3 %v2815_v5  ;;  %v2720_v0 = vld [vmem:[#allocation5 + $0x58] sm:$0xf0]  ;;  %v2867_v2 = vor.u32 %v3900_v58, %v2864_v59  ;;  %v3214_v5 = vld [vmem:[#allocation5 + $0x428] sm:$0xf]  ;;  %v3940_v59 = vld [vmem:[#allocation5 + $0x2ac] sm:$0xf] }
  0xa8   :  { %v2723_v10 = vor.u32 %v3864_v63, %v2720_v0  ;;  %v3424_v63 = vld [vmem:[#allocation5 + $0x5d8] sm:$0xf0] }
  0xa9   :  { %1688 = vmatpush.bf16.msrb.mxu0 %v2931_v12  ;;  %v3860_v12 = vld [vmem:[#allocation5 + $0x2c] sm:$0xf] }
  0xaa   :  { %1633 = vmatpush.bf16.msra.mxu1 %v3295_v11  ;;  %1598 = vmatmul.bf16.vlgmr.msra.gmra.mxu3 %v4487_v8  ;;  %v3359_v11 = vor.u32 %v4026_v4, %v3358_v3  ;;  %v2707_v22 = vor.u32 %v3860_v12, %v2704_v13  ;;  %v3152_v4 = vld [vmem:[#allocation5 + $0x3b8] sm:$0xf0] }
  0xab   :  { %1674 = vmatpush.bf16.msrb.mxu2 %v2803_v6  ;;  %1646 = vmatpush.bf16.msrb.mxu3 %v3439_v7  ;;  %v3990_v6 = vld [vmem:[#allocation5 + $0x434] sm:$0xf0]  ;;  %v3896_v7 = vld [vmem:[#allocation5 + $0x14c] sm:$0xf]  ;;  %v3408_v12 = vld [vmem:[#allocation5 + $0x5b8] sm:$0xf0] }
  0xac   :  { %1626 = vmatmul.bf16.vlgmr.msra.gmra.mxu2 %v4483_v60  ;;  %v3215_v14 = vor.u32 %v3990_v6, %v3214_v5  ;;  %v2851_v15 = vor.u32 %v3896_v7, %v2848_v9  ;;  %v4004_v5 = vld [vmem:[#allocation5 + $0x4ac] sm:$0xf]  ;;  %v3280_v6 = vld [vmem:[#allocation5 + $0x4b8] sm:$0xf0] }
  0xad   :  { %1689 = vmatpush.bf16.msrb.mxu0 %v2915_v24  ;;  %v3056_v24 = vld [vmem:[#allocation5 + $0x2f8] sm:$0xf0]  ;;  %v3936_v9 = vld [vmem:[#allocation5 + $0x28c] sm:$0xf] }
  0xae   :  { %1634 = vmatpush.bf16.msra.mxu1 %v3279_v23  ;;  %v3948_v23 = vld [vmem:[#allocation5 + $0x2ec] sm:$0xf] }
  0xaf   :  { %1675 = vmatpush.bf16.msrb.mxu2 %v2787_v19  ;;  %1647 = vmatpush.bf16.msrb.mxu3 %v3423_v20  ;;  %v3986_v19 = vld [vmem:[#allocation5 + $0x414] sm:$0xf0]  ;;  %v3892_v20 = vld [vmem:[#allocation5 + $0x12c] sm:$0xf]  ;;  %v3059_v34 = vor.u32 %v3948_v23, %v3056_v24 }
  0xb0   :  { %v3199_v29 = vor.u32 %v3986_v19, %v3198_v18  ;;  %v2835_v30 = vor.u32 %v3892_v20, %v2832_v21  ;;  %v4000_v18 = vld [vmem:[#allocation5 + $0x48c] sm:$0xf]  ;;  %v3264_v19 = vld [vmem:[#allocation5 + $0x498] sm:$0xf0] }
  0xb1   :  { %1690 = vmatpush.bf16.msrb.mxu0 %v2899_v36  ;;  %v3312_v36 = vld [vmem:[#allocation5 + $0x4f8] sm:$0xf0]  ;;  %v3932_v21 = vld [vmem:[#allocation5 + $0x26c] sm:$0xf] }
  0xb2   :  { %1635 = vmatpush.bf16.msra.mxu1 %v3263_v35  ;;  %v4012_v35 = vld [vmem:[#allocation5 + $0x4ec] sm:$0xf] }
  0xb3   :  { %1676 = vmatpush.bf16.msrb.mxu2 %v2771_v31  ;;  %1648 = vmatpush.bf16.msrb.mxu3 %v3407_v32  ;;  %v4018_v31 = vld [vmem:[#allocation5 + $0x514] sm:$0xf0]  ;;  %v3980_v32 = vld [vmem:[#allocation5 + $0x3ec] sm:$0xf]  ;;  %v3315_v48 = vor.u32 %v4012_v35, %v3312_v36 }
  0xb4   :  { %3462 = vmatmul.msk.bf16.vlgmr.msra.gmra.mxu0 %vm1376_vm0, %v4491_v50  ;;  %v3327_v44 = vor.u32 %v4018_v31, %v3326_v26  ;;  %v3187_v47 = vor.u32 %v3980_v32, %v3184_v33  ;;  %v4032_v23 = vld [vmem:[#allocation5 + $0x58c] sm:$0xf] }
  0xb5   :  { %1691 = vmatpush.bf16.msrb.mxu0 %v2883_v51  ;;  %v3043_v51 = vor.u32 %v3944_v38, %v3040_v40  ;;  %v3964_v26 = vld [vmem:[#allocation5 + $0x36c] sm:$0xf]  ;;  %v3104_v40 = vld [vmem:[#allocation5 + $0x358] sm:$0xf0] }
  0xb6   :  { %1636 = vmatpush.bf16.msra.mxu1 %v3247_v49  ;;  %v3976_v49 = vld [vmem:[#allocation5 + $0x3cc] sm:$0xf]  ;;  %v3123_v35 = vor.u32 %v3964_v26, %v3120_v28 }
  0xb7   :  { %1677 = vmatpush.bf16.msrb.mxu2 %v2755_v45  ;;  %1649 = vmatpush.bf16.msrb.mxu3 %v3391_v46  ;;  %v4044_v45 = vld [vmem:[#allocation5 + $0x5ec] sm:$0xf]  ;;  %v3440_v46 = vld [vmem:[#allocation5 + $0x5f8] sm:$0xf0]  ;;  %v3171_v0 = vor.u32 %v3976_v49, %v3168_v53 }
  0xb8   :  { %v3443_v58 = vor.u32 %v4044_v45, %v3440_v46  ;;  %v3928_v32 = vld [vmem:[#allocation5 + $0x24c] sm:$0xf]  ;;  %v2960_v46 = vld [vmem:[#allocation5 + $0x238] sm:$0xf0] }
  0xb9   :  { %1692 = vmatpush.bf16.msrb.mxu0 %v2867_v2  ;;  %v3972_v2 = vld [vmem:[#allocation5 + $0x3ac] sm:$0xf] }
  0xba   :  { %1637 = vmatpush.bf16.msra.mxu1 %v3231_v1  ;;  %v3299_v1 = vor.u32 %v4008_v56, %v3296_v57  ;;  %v3155_v13 = vor.u32 %v3972_v2, %v3152_v4  ;;  %v4028_v33 = vld [vmem:[#allocation5 + $0x56c] sm:$0xf]  ;;  %v3088_v57 = vld [vmem:[#allocation5 + $0x338] sm:$0xf0] }
  0xbb   :  { %1678 = vmatpush.bf16.msrb.mxu2 %v2739_v61  ;;  %1650 = vmatpush.bf16.msrb.mxu3 %v3375_v62  ;;  %v3024_v61 = vld [vmem:[#allocation5 + $0x2b8] sm:$0xf0]  ;;  %v4040_v62 = vld [vmem:[#allocation5 + $0x5cc] sm:$0xf] }
  0xbc   :  { %v3027_v3 = vor.u32 %v3940_v59, %v3024_v61  ;;  %v3427_v7 = vor.u32 %v4040_v62, %v3424_v63  ;;  %v3960_v38 = vld [vmem:[#allocation5 + $0x34c] sm:$0xf]  ;;  %v3216_v59 = vld [vmem:[#allocation5 + $0x438] sm:$0xf0] }
  0xbd   :  { %1693 = vmatpush.bf16.msrb.mxu0 %v2851_v15  ;;  %v3968_v15 = vld [vmem:[#allocation5 + $0x38c] sm:$0xf]  ;;  %v3107_v49 = vor.u32 %v3960_v38, %v3104_v40  ;;  %v3344_v2 = vld [vmem:[#allocation5 + $0x538] sm:$0xf0]  ;;  %v3506_v38 = vld [vmem:[#allocation8 + $0x50] sm:$0xf] }
  0xbe   :  { %1638 = vmatpush.bf16.msra.mxu1 %v3215_v14  ;;  %v3283_v14 = vor.u32 %v4004_v5, %v3280_v6  ;;  %v3139_v24 = vor.u32 %v3968_v15, %v3136_v17  ;;  %v3924_v45 = vld [vmem:[#allocation5 + $0x22c] sm:$0xf]  ;;  %v3456_v4 = vld [vmem:[#allocation5 + $0x618] sm:$0xf0] }
  0xbf   :  { %1679 = vmatpush.bf16.msrb.mxu2 %v2723_v10  ;;  %1651 = vmatpush.bf16.msrb.mxu3 %v3359_v11  ;;  %v3008_v10 = vld [vmem:[#allocation5 + $0x298] sm:$0xf0]  ;;  %v4036_v11 = vld [vmem:[#allocation5 + $0x5ac] sm:$0xf]  ;;  %v2963_v56 = vor.u32 %v3924_v45, %v2960_v46 }
  0xc0   :  { %v3011_v16 = vor.u32 %v3936_v9, %v3008_v10  ;;  %v3411_v20 = vor.u32 %v4036_v11, %v3408_v12  ;;  %v1389_v53 = vpop.f32.mrf.mxu0  ;;  %v3920_v63 = vld [vmem:[#allocation5 + $0x20c] sm:$0xf]  ;;  %v3072_v11 = vld [vmem:[#allocation5 + $0x318] sm:$0xf0] }
  0xc1   :  { %1694 = vmatpush.bf16.msrb.mxu0 %v2835_v30  ;;  %v3248_v30 = vld [vmem:[#allocation5 + $0x478] sm:$0xf0]  ;;  %v4519_v61 = vpop.f32.mrf.mxu1  ;;  %v3952_v10 = vld [vmem:[#allocation5 + $0x30c] sm:$0xf] }
  0xc2   :  { %1639 = vmatpush.bf16.msra.mxu1 %v3199_v29  ;;  %v3996_v29 = vld [vmem:[#allocation5 + $0x46c] sm:$0xf]  ;;  %v4066_v17 = vld [vmem:[#allocation8 + $0x74] sm:$0xf0] }
  0xc3   :  { %1680 = vmatpush.bf16.msrb.mxu2 %v2707_v22  ;;  %1652 = vmatpush.bf16.msrb.mxu3 %v3343_v25  ;;  %v2992_v22 = vld [vmem:[#allocation5 + $0x278] sm:$0xf0]  ;;  %v3267_v25 = vor.u32 %v4000_v18, %v3264_v19  ;;  %v3251_v36 = vor.u32 %v3996_v29, %v3248_v30  ;;  %v3984_v12 = vld [vmem:[#allocation5 + $0x40c] sm:$0xf]  ;;  %v4523_v18 = vld [vmem:[#allocation7] sm:$0xf] }
  0xc4   :  { %v2995_v27 = vor.u32 %v3932_v21, %v2992_v22  ;;  %v4016_v19 = vld [vmem:[#allocation5 + $0x50c] sm:$0xf]  ;;  %v3075_v21 = vor.u32 %v3952_v10, %v3072_v11 }
  0xc5   :  { %1640 = vmatmul.bf16.vlgmr.msra.gmra.mxu1 %v4495_v37  ;;  %1695 = vmatpush.bf16.msrb.mxu0 %v2819_v52  ;;  %v3956_v52 = vld [vmem:[#allocation5 + $0x32c] sm:$0xf] }
  0xc6   :  { %1702 = vmatpush.bf16.msrb.mxu1 %v3059_v34  ;;  %v3376_v34 = vld [vmem:[#allocation5 + $0x578] sm:$0xf0]  ;;  %v3091_v5 = vor.u32 %v3956_v52, %v3088_v57  ;;  %v4064_v28 = vld [vmem:[#allocation8 + $0x64] sm:$0xf0] }
  0xc7   :  { %1681 = vmatpush.bf16.msrb.mxu2 %v2691_v39  ;;  %1653 = vmatpush.bf16.msrb.mxu3 %v3327_v44  ;;  %v3379_v44 = vor.u32 %v4028_v33, %v3376_v34  ;;  %v3578_v33 = vld [vmem:[#allocation8 + $0xe0] sm:$0xf]  ;;  %v4080_v34 = vld [vmem:[#allocation8 + $0xe4] sm:$0xf0] }
  0xc8   :  { %1696 = vmatmul.bf16.vlgmr.msrb.gmra.mxu0 %v4487_v8  ;;  %v2976_v8 = vld [vmem:[#allocation5 + $0x258] sm:$0xf0]  ;;  %v1391_v30 = vpop.f32.mrf.mxu0  ;;  %v3579_v40 = vor.u32 %v4080_v34, %v3578_v33 }
  0xc9   :  { %1744 = vmatpush.bf16.msra.mxu0 %v3443_v58  ;;  %v2979_v39 = vor.u32 %v3928_v32, %v2976_v8  ;;  %v3988_v58 = vld [vmem:[#allocation5 + $0x42c] sm:$0xf] }
  0xca   :  { %1703 = vmatpush.bf16.msrb.mxu1 %v3043_v51  ;;  %1654 = vmatmul.bf16.vlgmr.msrb.gmra.mxu3 %v4497_v42  ;;  %v3235_v51 = vor.u32 %v3992_v41, %v3232_v43  ;;  %v3219_v6 = vor.u32 %v3988_v58, %v3216_v59  ;;  %v3570_v43 = vld [vmem:[#allocation8 + $0xd0] sm:$0xf]  ;;  %v4058_v58 = vld [vmem:[#allocation8 + $0x34] sm:$0xf0] }
  0xcb   :  { %1716 = vmatpush.bf16.msra.mxu3 %v3187_v47  ;;  %1730 = vmatpush.bf16.msra.mxu2 %v3315_v48  ;;  %v4024_v47 = vld [vmem:[#allocation5 + $0x54c] sm:$0xf]  ;;  %v3360_v48 = vld [vmem:[#allocation5 + $0x558] sm:$0xf0]  ;;  %v1431_v32 = vpop.f32.mrf.mxu3 }
  0xcc   :  { %1682 = vmatmul.bf16.vlgmr.msrb.gmra.mxu2 %v4481_v55  ;;  %v3392_v55 = vld [vmem:[#allocation5 + $0x598] sm:$0xf0]  ;;  %v3363_v62 = vor.u32 %v4024_v47, %v3360_v48  ;;  %v3498_v47 = vld [vmem:[#allocation8 + $0x40] sm:$0xf]  ;;  %v4060_v48 = vld [vmem:[#allocation8 + $0x44] sm:$0xf0] }
  0xcd   :  { %1745 = vmatpush.bf16.msra.mxu0 %v3427_v7  ;;  %v3395_v31 = vor.u32 %v4032_v23, %v3392_v55  ;;  %v4521_v7 = vpop.f32.mrf.mxu2  ;;  %v3586_v55 = vld [vmem:[#allocation8 + $0xf0] sm:$0xf] }
  0xce   :  { %1704 = vmatpush.bf16.msrb.mxu1 %v3027_v3  ;;  %v4048_v3 = vld [vmem:[#allocation5 + $0x60c] sm:$0xf] }
  0xcf   :  { %1717 = vmatpush.bf16.msra.mxu3 %v3171_v0  ;;  %1731 = vmatpush.bf16.msra.mxu2 %v3299_v1  ;;  %v2944_v0 = vld [vmem:[#allocation5 + $0x218] sm:$0xf0]  ;;  %v4020_v1 = vld [vmem:[#allocation5 + $0x52c] sm:$0xf]  ;;  %v3459_v15 = vor.u32 %v4048_v3, %v3456_v4  ;;  %v3482_v4 = vld [vmem:[#allocation8 + $0x20] sm:$0xf] }
  0xd0   :  { %v2947_v9 = vor.u32 %v3920_v63, %v2944_v0  ;;  %v3554_v0 = vld [vmem:[#allocation8 + $0xb0] sm:$0xf] }
  0xd1   :  { %1746 = vmatpush.bf16.msra.mxu0 %v3411_v20  ;;  %v3328_v20 = vld [vmem:[#allocation5 + $0x518] sm:$0xf0] }
  0xd2   :  { %1705 = vmatpush.bf16.msrb.mxu1 %v3011_v16  ;;  %v3522_v16 = vld [vmem:[#allocation8 + $0x70] sm:$0xf]  ;;  %v3331_v26 = vor.u32 %v4016_v19, %v3328_v20 }
  0xd3   :  { %1718 = vmatpush.bf16.msra.mxu3 %v3155_v13  ;;  %1732 = vmatpush.bf16.msra.mxu2 %v3283_v14  ;;  %v3347_v13 = vor.u32 %v4020_v1, %v3344_v2  ;;  %v3200_v14 = vld [vmem:[#allocation5 + $0x418] sm:$0xf0]  ;;  %v3523_v23 = vor.u32 %v4066_v17, %v3522_v16  ;;  %v3474_v16 = vld [vmem:[#allocation8 + $0x10] sm:$0xf] }
  0xd4   :  { %v3203_v22 = vor.u32 %v3984_v12, %v3200_v14  ;;  %v4074_v1 = vld [vmem:[#allocation8 + $0xb4] sm:$0xf0]  ;;  %v4072_v14 = vld [vmem:[#allocation8 + $0xa4] sm:$0xf0] }
  0xd5   :  { %1747 = vmatpush.bf16.msra.mxu0 %v3395_v31  ;;  %v1405_v31 = vpop.f32.mrf.mxu1  ;;  %v1419_v41 = vpop.f32.mrf.mxu2  ;;  %v4054_v17 = vld [vmem:[#allocation8 + $0x14] sm:$0xf0] }
  0xd6   :  { %1706 = vmatpush.bf16.msrb.mxu1 %v2995_v27  ;;  %v3514_v27 = vld [vmem:[#allocation8 + $0x60] sm:$0xf] }
  0xd7   :  { %1719 = vmatpush.bf16.msra.mxu3 %v3139_v24  ;;  %1733 = vmatpush.bf16.msra.mxu2 %v3267_v25  ;;  %v4082_v24 = vld [vmem:[#allocation8 + $0xf4] sm:$0xf0]  ;;  %v353_v25 = vperm.slane %v4523_v18, 0  ;;  %v3515_v8 = vor.u32 %v4064_v28, %v3514_v27  ;;  %v4065_v27 = vld [vmem:[#allocation8 + $0x74] sm:$0xf] }
  0xd8   :  { %v3587_v29 = vor.u32 %v4082_v24, %v3586_v55  ;;  %v4070_v55 = vld [vmem:[#allocation8 + $0x94] sm:$0xf0]  ;;  %v3524_v28 = vld [vmem:[#allocation8 + $0x78] sm:$0xf0] }
  0xd9   :  { %1748 = vmatpush.bf16.msra.mxu0 %v3379_v44  ;;  %v4078_v44 = vld [vmem:[#allocation8 + $0xd4] sm:$0xf0]  ;;  %v3527_v34 = vor.u32 %v4065_v27, %v3524_v28  ;;  %v3540_v27 = vld [vmem:[#allocation8 + $0x98] sm:$0xf0] }
  0xda   :  { %1707 = vmatpush.bf16.msrb.mxu1 %v2979_v39  ;;  %v4062_v39 = vld [vmem:[#allocation8 + $0x54] sm:$0xf0] }
  0xdb   :  { %1720 = vmatpush.bf16.msra.mxu3 %v3123_v35  ;;  %1734 = vmatpush.bf16.msra.mxu2 %v3251_v36  ;;  %v1390_v35 = vadd.f32 %v1389_v53, %v353_v25  ;;  %v1392_v36 = vadd.f32 %v1391_v30, %v353_v25  ;;  %v3499_v53 = vor.u32 %v4060_v48, %v3498_v47  ;;  %v3466_v25 = vld [vmem:[#allocation8] sm:$0xf]  ;;  %v4061_v47 = vld [vmem:[#allocation8 + $0x54] sm:$0xf]  ;;  %v3508_v48 = vld [vmem:[#allocation8 + $0x58] sm:$0xf0] }
  0xdd   :  { %1749 = vmatpush.bf16.msra.mxu0 %v3363_v62  ;;  %v1404_v45 = vadd.f32 %v4519_v61, %v1390_v35  ;;  %v1406_v46 = vadd.f32 %v1405_v31, %v1392_v36  ;;  %v1433_v62 = vpop.f32.mrf.mxu3  ;;  %v1473_v61 = vpop.f32.mrf.mxu2  ;;  %v3530_v31 = vld [vmem:[#allocation8 + $0x80] sm:$0xf]  ;;  %v4081_v36 = vld [vmem:[#allocation8 + $0xf4] sm:$0xf] }
  0xde   :  { %1708 = vmatpush.bf16.msrb.mxu1 %v2963_v56  ;;  %v4076_v56 = vld [vmem:[#allocation8 + $0xc4] sm:$0xf0] }
  0xdf   :  { %1721 = vmatpush.bf16.msra.mxu3 %v3107_v49  ;;  %1735 = vmatpush.bf16.msra.mxu2 %v3235_v51  ;;  %v3571_v49 = vor.u32 %v4078_v44, %v3570_v43  ;;  %v1420_v57 = vadd.f32 %v1419_v41, %v1406_v46  ;;  %v3580_v46 = vld [vmem:[#allocation8 + $0xe8] sm:$0xf0] }
  0xe1   :  { %1750 = vmatpush.bf16.msra.mxu0 %v3347_v13  ;;  %v1445_v51 = vpop.f32.mrf.mxu0  ;;  %v1434_v3 = vadd.f32 %v1433_v62, %v1420_v57  ;;  %v3546_v13 = vld [vmem:[#allocation8 + $0xa0] sm:$0xf]  ;;  %v3564_v62 = vld [vmem:[#allocation8 + $0xc8] sm:$0xf0] }
  0xe2   :  { %1709 = vmatpush.bf16.msrb.mxu1 %v2947_v9  ;;  %v1459_v52 = vpop.f32.mrf.mxu1  ;;  %v3547_v19 = vor.u32 %v4072_v14, %v3546_v13 }
  0xe3   :  { %1722 = vmatpush.bf16.msra.mxu3 %v3091_v5  ;;  %1736 = vmatpush.bf16.msra.mxu2 %v3219_v6  ;;  %v4056_v5 = vld [vmem:[#allocation8 + $0x24] sm:$0xf0]  ;;  %v3555_v6 = vor.u32 %v4074_v1, %v3554_v0 }
  0xe4   :  { %v3483_v12 = vor.u32 %v4056_v5, %v3482_v4  ;;  %v4055_v4 = vld [vmem:[#allocation8 + $0x24] sm:$0xf]  ;;  %v3484_v5 = vld [vmem:[#allocation8 + $0x28] sm:$0xf0] }
  0xe5   :  { %1710 = vmatmul.bf16.vlgmr.msrb.gmra.mxu1 %v4479_v54  ;;  %1751 = vmatpush.bf16.msra.mxu0 %v3331_v26  ;;  %v3507_v54 = vor.u32 %v4062_v39, %v3506_v38  ;;  %v3588_v38 = vld [vmem:[#allocation8 + $0xf8] sm:$0xf0]  ;;  %v4063_v39 = vld [vmem:[#allocation8 + $0x64] sm:$0xf] }
  0xe6   :  { %1765 = vmatpush.bf16.msra.mxu1 %v3459_v15  ;;  %v3591_v41 = vor.u32 %v4081_v36, %v3588_v38 }
  0xe7   :  { %1723 = vmatpush.bf16.msra.mxu3 %v3075_v21  ;;  %1737 = vmatpush.bf16.msra.mxu2 %v3203_v22  ;;  %v1475_v21 = vpop.f32.mrf.mxu2  ;;  %v3475_v22 = vor.u32 %v4054_v17, %v3474_v16  ;;  %v4071_v16 = vld [vmem:[#allocation8 + $0xa4] sm:$0xf]  ;;  %v3548_v17 = vld [vmem:[#allocation8 + $0xa8] sm:$0xf0] }
  0xe8   :  { %1752 = vmatmul.bf16.vlgmr.msra.gmra.mxu0 %v4497_v42  ;;  %v3490_v42 = vld [vmem:[#allocation8 + $0x30] sm:$0xf] }
  0xe9   :  { %v3491_v63 = vor.u32 %v4058_v58, %v3490_v42  ;;  %v1447_v9 = vpop.f32.mrf.mxu0  ;;  %v4534_v33 = vpop.f32.mrf.mxu3 }
  0xea   :  { %2188 = vmatpush.bf16.msrb.mxu1 %v3587_v29  ;;  %1724 = vmatmul.bf16.vlgmr.msra.gmra.mxu3 %v4483_v60  ;;  %v3562_v60 = vld [vmem:[#allocation8 + $0xc0] sm:$0xf]  ;;  %v1461_v11 = vpop.f32.mrf.mxu1 }
  0xeb   :  { %2174 = vmatpush.bf16.msrb.mxu3 %v3523_v23  ;;  %1738 = vmatmul.bf16.vlgmr.msra.gmra.mxu2 %v4495_v37  ;;  %v1418_v37 = vadd.f32 %v4521_v7, %v1404_v45  ;;  %v3563_v59 = vor.u32 %v4076_v56, %v3562_v60  ;;  %v1448_v7 = vadd.f32 %v1447_v9, %v1434_v3  ;;  %v3538_v23 = vld [vmem:[#allocation8 + $0x90] sm:$0xf]  ;;  %v4079_v45 = vld [vmem:[#allocation8 + $0xe4] sm:$0xf]  ;;  %v3500_v56 = vld [vmem:[#allocation8 + $0x48] sm:$0xf0] }
  0xec   :  { %v3539_v26 = vor.u32 %v4070_v55, %v3538_v23  ;;  %v4059_v60 = vld [vmem:[#allocation8 + $0x44] sm:$0xf]  ;;  %v3556_v3 = vld [vmem:[#allocation8 + $0xb8] sm:$0xf0]  ;;  %v3642_v23 = vld [vmem:[#allocation8 + $0x160] sm:$0xf] }
  0xed   :  { %v1432_v2 = vadd.f32 %v1431_v32, %v1418_v37  ;;  %v1462_v15 = vadd.f32 %v1461_v11, %v1448_v7  ;;  %v4068_v32 = vld [vmem:[#allocation8 + $0x84] sm:$0xf0]  ;;  %v3503_v58 = vor.u32 %v4059_v60, %v3500_v56  ;;  %v3650_v7 = vld [vmem:[#allocation8 + $0x170] sm:$0xf]  ;;  %v4098_v11 = vld [vmem:[#allocation8 + $0x174] sm:$0xf0] }
  0xee   :  { %2189 = vmatpush.bf16.msrb.mxu1 %v3579_v40  ;;  %v3531_v35 = vor.u32 %v4068_v32, %v3530_v31  ;;  %v3516_v40 = vld [vmem:[#allocation8 + $0x68] sm:$0xf0]  ;;  %v3651_v13 = vor.u32 %v4098_v11, %v3650_v7  ;;  %v4096_v55 = vld [vmem:[#allocation8 + $0x164] sm:$0xf0]  ;;  %v4090_v60 = vld [vmem:[#allocation8 + $0x134] sm:$0xf0] }
  0xef   :  { %2175 = vmatpush.bf16.msrb.mxu3 %v3515_v8  ;;  %v1446_v10 = vadd.f32 %v1445_v51, %v1432_v2  ;;  %v1476_v24 = vadd.f32 %v1475_v21, %v1462_v15  ;;  %v3519_v44 = vor.u32 %v4063_v39, %v3516_v40  ;;  %v3511_v51 = vor.u32 %v4061_v47, %v3508_v48  ;;  %v1501_v57 = vpop.f32.mrf.mxu2  ;;  %v4073_v2 = vld [vmem:[#allocation8 + $0xb4] sm:$0xf]  ;;  %v4067_v40 = vld [vmem:[#allocation8 + $0x84] sm:$0xf]  ;;  %v4092_v47 = vld [vmem:[#allocation8 + $0x144] sm:$0xf0] }
  0xf0   :  { %v3487_v15 = vor.u32 %v4055_v4, %v3484_v5  ;;  %2202 = vmatpush.bf16.msrb.mxu2 %v3651_v13  ;;  %v3551_v21 = vor.u32 %v4071_v16, %v3548_v17  ;;  %v3594_v11 = vld [vmem:[#allocation8 + $0x100] sm:$0xf]  ;;  %v4095_v17 = vld [vmem:[#allocation8 + $0x164] sm:$0xf] }
  0xf1   :  { %v1460_v20 = vadd.f32 %v1459_v52, %v1446_v10  ;;  %v1776_v8 = vmax.f32 %v1476_v24, 0.0  ;;  %v4077_v52 = vld [vmem:[#allocation8 + $0xd4] sm:$0xf]  ;;  %v1489_v42 = vpop.f32.mrf.mxu3 }
  0xf2   :  { %2190 = vmatpush.bf16.msrb.mxu1 %v3571_v49  ;;  %v3583_v49 = vor.u32 %v4079_v45, %v3580_v46  ;;  %v3626_v46 = vld [vmem:[#allocation8 + $0x140] sm:$0xf] }
  0xf3   :  { %2176 = vmatpush.bf16.msrb.mxu3 %v3507_v54  ;;  %v1474_v29 = vadd.f32 %v1473_v61, %v1460_v20  ;;  %v4057_v61 = vld [vmem:[#allocation8 + $0x34] sm:$0xf]  ;;  %v3476_v20 = vld [vmem:[#allocation8 + $0x18] sm:$0xf0] }
  0xf5   :  { %3463 = vmatmul.msk.bf16.vlgmr.msra.gmra.mxu1 %vm1376_vm0, %v4491_v50  ;;  %v4052_v50 = vld [vmem:[#allocation8 + $0x4] sm:$0xf0]  ;;  %v1772_v54 = vmax.f32 %v1474_v29, 0.0  ;;  %v4051_v29 = vld [vmem:[#allocation8 + $0x4] sm:$0xf] }
  0xf6   :  { %2191 = vmatpush.bf16.msrb.mxu1 %v3563_v59  ;;  %v3467_v30 = vor.u32 %v4052_v50, %v3466_v25  ;;  %v4075_v59 = vld [vmem:[#allocation8 + $0xc4] sm:$0xf]  ;;  %v3643_v25 = vor.u32 %v4096_v55, %v3642_v23  ;;  %v4114_v23 = vld [vmem:[#allocation8 + $0x1f4] sm:$0xf0] }
  0xf7   :  { %2177 = vmatpush.bf16.msrb.mxu3 %v3499_v53  ;;  %v4536_v43 = vpack.c.bf16 %v1776_v8, %v1772_v54  ;;  %v3572_v53 = vld [vmem:[#allocation8 + $0xd8] sm:$0xf0]  ;;  %v3567_v0 = vor.u32 %v4075_v59, %v3564_v62  ;;  %v1503_v14 = vpop.f32.mrf.mxu2  ;;  %v3634_v8 = vld [vmem:[#allocation8 + $0x150] sm:$0xf]  ;;  %v3610_v62 = vld [vmem:[#allocation8 + $0x120] sm:$0xf] }
  0xf8   :  { %v3575_v37 = vor.u32 %v4077_v52, %v3572_v53  ;;  %2203 = vmatpush.bf16.msrb.mxu2 %v3643_v25  ;;  %v3618_v53 = vld [vmem:[#allocation8 + $0x130] sm:$0xf]  ;;  %v4093_v25 = vld [vmem:[#allocation8 + $0x154] sm:$0xf] }
  0xfa   :  { %2192 = vmatpush.bf16.msrb.mxu1 %v3555_v6  ;;  %v3559_v6 = vor.u32 %v4073_v2, %v3556_v3  ;;  %v4086_v2 = vld [vmem:[#allocation8 + $0x114] sm:$0xf0] }
  0xfb   :  { %2178 = vmatpush.bf16.msrb.mxu3 %v3491_v63  ;;  %v3492_v63 = vld [vmem:[#allocation8 + $0x38] sm:$0xf0] }
  0xfc   :  { %v3495_v1 = vor.u32 %v4057_v61, %v3492_v63  ;;  %v4088_v61 = vld [vmem:[#allocation8 + $0x124] sm:$0xf0] }
  0xfe   :  { %2193 = vmatpush.bf16.msrb.mxu1 %v3547_v19  ;;  %v4053_v19 = vld [vmem:[#allocation8 + $0x14] sm:$0xf] }
  0xff   :  { %2179 = vmatpush.bf16.msrb.mxu3 %v3483_v12  ;;  %v354_v12 = vperm.slane %v4523_v18, 1  ;;  %v3479_v50 = vor.u32 %v4053_v19, %v3476_v20  ;;  %v3644_v19 = vld [vmem:[#allocation8 + $0x168] sm:$0xf0] }
 0x101   :  { %v1515_v9 = vpop.f32.mrf.mxu0  ;;  %v1488_v24 = vadd.f32 %v4534_v33, %v354_v12  ;;  %v1490_v28 = vadd.f32 %v1489_v42, %v354_v12 }
 0x102   :  { %2194 = vmatpush.bf16.msrb.mxu1 %v3539_v26  ;;  %v4069_v26 = vld [vmem:[#allocation8 + $0x94] sm:$0xf] }
 0x103   :  { %2180 = vmatpush.bf16.msrb.mxu3 %v3475_v22  ;;  %v1529_v22 = vpop.f32.mrf.mxu1  ;;  %v3543_v31 = vor.u32 %v4069_v26, %v3540_v27  ;;  %v1504_v54 = vadd.f32 %v1503_v14, %v1490_v28  ;;  %v4097_v14 = vld [vmem:[#allocation8 + $0x174] sm:$0xf]  ;;  %v3706_v27 = vld [vmem:[#allocation8 + $0x1e0] sm:$0xf]  ;;  %v4112_v28 = vld [vmem:[#allocation8 + $0x1e4] sm:$0xf0] }
 0x106   :  { %2195 = vmatpush.bf16.msrb.mxu1 %v3531_v35  ;;  %v1502_v35 = vadd.f32 %v1501_v57, %v1488_v24 }
 0x107   :  { %2181 = vmatpush.bf16.msrb.mxu3 %v3467_v30  ;;  %v3468_v30 = vld [vmem:[#allocation8 + $0x8] sm:$0xf0] }
 0x108   :  { %v3471_v33 = vor.u32 %v4051_v29, %v3468_v30  ;;  %v3707_v29 = vor.u32 %v4112_v28, %v3706_v27  ;;  %v4091_v30 = vld [vmem:[#allocation8 + $0x144] sm:$0xf] }
 0x109   :  { %v1543_v10 = vpop.f32.mrf.mxu3  ;;  %v1517_v38 = vpop.f32.mrf.mxu0 }
 0x10a   :  { %2244 = vmatpush.bf16.msra.mxu1 %v3591_v41  ;;  %2182 = vmatmul.bf16.vlgmr.msrb.gmra.mxu3 %v4536_v43  ;;  %v3532_v41 = vld [vmem:[#allocation8 + $0x88] sm:$0xf0]  ;;  %v1518_v48 = vadd.f32 %v1517_v38, %v1504_v54  ;;  %v3690_v54 = vld [vmem:[#allocation8 + $0x1c0] sm:$0xf] }
 0x10b   :  { %2230 = vmatpush.bf16.msra.mxu3 %v3527_v34  ;;  %v4094_v34 = vld [vmem:[#allocation8 + $0x154] sm:$0xf0]  ;;  %v3535_v45 = vor.u32 %v4067_v40, %v3532_v41  ;;  %v355_v40 = vperm.slane %v4523_v18, 2 }
 0x10c   :  { %v3635_v36 = vor.u32 %v4094_v34, %v3634_v8  ;;  %v3698_v8 = vld [vmem:[#allocation8 + $0x1d0] sm:$0xf]  ;;  %v4110_v34 = vld [vmem:[#allocation8 + $0x1d4] sm:$0xf0] }
 0x10d   :  { %v1557_v39 = vpop.f32.mrf.mxu2 }
 0x10e   :  { %2245 = vmatpush.bf16.msra.mxu1 %v3583_v49  ;;  %2204 = vmatpush.bf16.msrb.mxu2 %v3635_v36  ;;  %v3627_v49 = vor.u32 %v4092_v47, %v3626_v46  ;;  %v3699_v36 = vor.u32 %v4110_v34, %v3698_v8  ;;  %v4087_v47 = vld [vmem:[#allocation8 + $0x124] sm:$0xf]  ;;  %v3700_v8 = vld [vmem:[#allocation8 + $0x1d8] sm:$0xf0] }
 0x10f   :  { %2231 = vmatpush.bf16.msra.mxu3 %v3519_v44  ;;  %v1516_v44 = vadd.f32 %v1515_v9, %v1502_v35 }
 0x111   :  { %v1545_v32 = vpop.f32.mrf.mxu3  ;;  %v1530_v52 = vadd.f32 %v1529_v22, %v1516_v44  ;;  %v3714_v22 = vld [vmem:[#allocation8 + $0x1f0] sm:$0xf]  ;;  %v4108_v44 = vld [vmem:[#allocation8 + $0x1c4] sm:$0xf0] }
 0x112   :  { %2246 = vmatpush.bf16.msra.mxu1 %v3575_v37  ;;  %2205 = vmatpush.bf16.msrb.mxu2 %v3627_v49  ;;  %v3619_v37 = vor.u32 %v4090_v60, %v3618_v53  ;;  %v3715_v55 = vor.u32 %v4114_v23, %v3714_v22  ;;  %v3691_v46 = vor.u32 %v4108_v44, %v3690_v54  ;;  %v4106_v53 = vld [vmem:[#allocation8 + $0x1b4] sm:$0xf0]  ;;  %v3716_v22 = vld [vmem:[#allocation8 + $0x1f8] sm:$0xf0] }
 0x113   :  { %2232 = vmatpush.bf16.msra.mxu3 %v3511_v51  ;;  %v1531_v51 = vpop.f32.mrf.mxu1  ;;  %v1544_v57 = vadd.f32 %v1543_v10, %v1530_v52  ;;  %v3682_v52 = vld [vmem:[#allocation8 + $0x1b0] sm:$0xf] }
 0x114   :  { %v1532_v42 = vadd.f32 %v1531_v51, %v1518_v48  ;;  %2216 = vmatpush.bf16.msrb.mxu0 %v3715_v55  ;;  %v3612_v48 = vld [vmem:[#allocation8 + $0x128] sm:$0xf0]  ;;  %v3683_v60 = vor.u32 %v4106_v53, %v3682_v52 }
 0x115   :  { %v1559_v59 = vpop.f32.mrf.mxu2  ;;  %v1558_v63 = vadd.f32 %v1557_v39, %v1544_v57  ;;  %v4089_v39 = vld [vmem:[#allocation8 + $0x134] sm:$0xf]  ;;  %v3615_v51 = vor.u32 %v4087_v47, %v3612_v48  ;;  %v3684_v47 = vld [vmem:[#allocation8 + $0x1b8] sm:$0xf0] }
 0x116   :  { %2247 = vmatpush.bf16.msra.mxu1 %v3567_v0  ;;  %2206 = vmatpush.bf16.msrb.mxu2 %v3619_v37  ;;  %v3611_v0 = vor.u32 %v4088_v61, %v3610_v62 }
 0x117   :  { %2233 = vmatpush.bf16.msra.mxu3 %v3503_v58  ;;  %v1546_v58 = vadd.f32 %v1545_v32, %v1532_v42  ;;  %v4085_v42 = vld [vmem:[#allocation8 + $0x114] sm:$0xf] }
 0x118   :  { %2217 = vmatpush.bf16.msrb.mxu0 %v3707_v29 }
 0x119   :  { %v1571_v56 = vpop.f32.mrf.mxu3  ;;  %v1560_v3 = vadd.f32 %v1559_v59, %v1546_v58  ;;  %v3604_v58 = vld [vmem:[#allocation8 + $0x118] sm:$0xf0] }
 0x11a   :  { %2248 = vmatpush.bf16.msra.mxu1 %v3559_v6  ;;  %v1572_v4 = vadd.f32 %v1571_v56, %v1558_v63  ;;  %2207 = vmatpush.bf16.msrb.mxu2 %v3611_v0  ;;  %v3607_v61 = vor.u32 %v4085_v42, %v3604_v58  ;;  %v3674_v63 = vld [vmem:[#allocation8 + $0x1a0] sm:$0xf]  ;;  %v4104_v0 = vld [vmem:[#allocation8 + $0x1a4] sm:$0xf0]  ;;  %v4101_v42 = vld [vmem:[#allocation8 + $0x194] sm:$0xf] }
 0x11b   :  { %2234 = vmatpush.bf16.msra.mxu3 %v3495_v1  ;;  %v3602_v1 = vld [vmem:[#allocation8 + $0x110] sm:$0xf]  ;;  %v3668_v58 = vld [vmem:[#allocation8 + $0x198] sm:$0xf0] }
 0x11c   :  { %v3603_v5 = vor.u32 %v4086_v2, %v3602_v1  ;;  %v1773_v7 = vmax.f32 %v1572_v4, 0.0  ;;  %2218 = vmatpush.bf16.msrb.mxu0 %v3699_v36  ;;  %v3675_v2 = vor.u32 %v4104_v0, %v3674_v63  ;;  %v3596_v4 = vld [vmem:[#allocation8 + $0x108] sm:$0xf0] }
 0x11e   :  { %2249 = vmatpush.bf16.msra.mxu1 %v3551_v21  ;;  %2208 = vmatpush.bf16.msrb.mxu2 %v3603_v5  ;;  %v3647_v21 = vor.u32 %v4095_v17, %v3644_v19 }
 0x11f   :  { %2235 = vmatpush.bf16.msra.mxu3 %v3487_v15  ;;  %v3652_v15 = vld [vmem:[#allocation8 + $0x178] sm:$0xf0] }
 0x120   :  { %v3655_v16 = vor.u32 %v4097_v14, %v3652_v15  ;;  %2219 = vmatpush.bf16.msrb.mxu0 %v3691_v46  ;;  %v3658_v15 = vld [vmem:[#allocation8 + $0x180] sm:$0xf]  ;;  %v4105_v46 = vld [vmem:[#allocation8 + $0x1b4] sm:$0xf] }
 0x121   :  { %v1573_v6 = vpop.f32.mrf.mxu3  ;;  %v1613_v20 = vpop.f32.mrf.mxu0  ;;  %v3687_v48 = vor.u32 %v4105_v46, %v3684_v47  ;;  %v4138_v46 = vld [vmem:[#allocation11 + $0x38] sm:$0xff] }
 0x122   :  { %2250 = vmatpush.bf16.msra.mxu1 %v3543_v31  ;;  %v1574_v9 = vadd.f32 %v1573_v6, %v1560_v3  ;;  %v1585_v24 = vpop.f32.mrf.mxu1  ;;  %v3628_v31 = vld [vmem:[#allocation8 + $0x148] sm:$0xf0]  ;;  %v4083_v3 = vld [vmem:[#allocation8 + $0x104] sm:$0xf] }
 0x123   :  { %2236 = vmatpush.bf16.msra.mxu3 %v3479_v50  ;;  %v3636_v50 = vld [vmem:[#allocation8 + $0x158] sm:$0xf0]  ;;  %v3631_v32 = vor.u32 %v4091_v30, %v3628_v31  ;;  %v1586_v49 = vadd.f32 %v1585_v24, %v355_v40 }
 0x124   :  { %v1777_v10 = vmax.f32 %v1574_v9, 0.0  ;;  %v3639_v26 = vor.u32 %v4093_v25, %v3636_v50  ;;  %2220 = vmatpush.bf16.msrb.mxu0 %v3683_v60  ;;  %v3599_v9 = vor.u32 %v4083_v3, %v3596_v4  ;;  %v4111_v50 = vld [vmem:[#allocation8 + $0x1e4] sm:$0xf] }
 0x126   :  { %2251 = vmatpush.bf16.msra.mxu1 %v3535_v45  ;;  %v1781_v12 = vpack.c.bf16 %v1777_v10, %v1773_v7  ;;  %v3666_v7 = vld [vmem:[#allocation8 + $0x190] sm:$0xf]  ;;  %v4102_v10 = vld [vmem:[#allocation8 + $0x194] sm:$0xf0] }
 0x127   :  { %2237 = vmatpush.bf16.msra.mxu3 %v3471_v33  ;;  %v3620_v33 = vld [vmem:[#allocation8 + $0x138] sm:$0xf0] }
 0x128   :  { %2196 = vmatmul.bf16.vlgmr.msrb.gmra.mxu1 %v1781_v12  ;;  %v3623_v41 = vor.u32 %v4089_v39, %v3620_v33  ;;  %2221 = vmatpush.bf16.msrb.mxu0 %v3675_v2 }
 0x129   :  { %v1615_v38 = vpop.f32.mrf.mxu0 }
 0x12a   :  { %2238 = vmatmul.bf16.vlgmr.msra.gmra.mxu3 %v4536_v43  ;;  %v4084_v43 = vld [vmem:[#allocation8 + $0x104] sm:$0xf0]  ;;  %v1587_v45 = vpop.f32.mrf.mxu1 }
 0x12b   :  { %v3595_v13 = vor.u32 %v4084_v43, %v3594_v11  ;;  %v1588_v62 = vadd.f32 %v1587_v45, %v355_v40  ;;  %v3667_v11 = vor.u32 %v4102_v10, %v3666_v7  ;;  %v4107_v40 = vld [vmem:[#allocation8 + $0x1c4] sm:$0xf]  ;;  %v356_v45 = vperm.slane %v4523_v18, 3  ;;  %v3660_v18 = vld [vmem:[#allocation8 + $0x188] sm:$0xf0] }
 0x12d   :  { %2209 = vmatpush.bf16.msrb.mxu2 %v3595_v13  ;;  %v1599_v35 = vpop.f32.mrf.mxu3  ;;  %2222 = vmatpush.bf16.msrb.mxu0 %v3667_v11 }
 0x12e   :  { %v1600_v59 = vadd.f32 %v1599_v35, %v1586_v49  ;;  %v4103_v49 = vld [vmem:[#allocation8 + $0x1a4] sm:$0xf] }
 0x12f   :  { %v1627_v37 = vpop.f32.mrf.mxu2 }
 0x130   :  { %v1614_v5 = vadd.f32 %v1613_v20, %v1600_v59  ;;  %v3671_v59 = vor.u32 %v4101_v42, %v3668_v58 }
 0x131   :  { %2258 = vmatpush.bf16.msra.mxu2 %v3655_v16  ;;  %v1669_v56 = vpop.f32.mrf.mxu0  ;;  %v4100_v16 = vld [vmem:[#allocation8 + $0x184] sm:$0xf0] }
 0x132   :  { %v3659_v19 = vor.u32 %v4100_v16, %v3658_v15 }
 0x134   :  { %2223 = vmatpush.bf16.msrb.mxu0 %v3659_v19 }
 0x135   :  { %2259 = vmatpush.bf16.msra.mxu2 %v3647_v21  ;;  %v1601_v57 = vpop.f32.mrf.mxu3  ;;  %v4113_v21 = vld [vmem:[#allocation8 + $0x1f4] sm:$0xf] }
 0x136   :  { %v1602_v6 = vadd.f32 %v1601_v57, %v1588_v62  ;;  %v3719_v55 = vor.u32 %v4113_v21, %v3716_v22  ;;  %v4099_v62 = vld [vmem:[#allocation8 + $0x184] sm:$0xf] }
 0x137   :  { %v1629_v17 = vpop.f32.mrf.mxu2 }
 0x138   :  { %2252 = vmatmul.bf16.vlgmr.msra.gmra.mxu1 %v1781_v12  ;;  %v1628_v12 = vadd.f32 %v1627_v37, %v1614_v5  ;;  %v1616_v13 = vadd.f32 %v1615_v38, %v1602_v6  ;;  %2272 = vmatpush.bf16.msra.mxu0 %v3719_v55 }
 0x139   :  { %2260 = vmatpush.bf16.msra.mxu2 %v3639_v26  ;;  %v1671_v14 = vpop.f32.mrf.mxu0  ;;  %v3708_v26 = vld [vmem:[#allocation8 + $0x1e8] sm:$0xf0] }
 0x13a   :  { %v1630_v24 = vadd.f32 %v1629_v17, %v1616_v13  ;;  %v3711_v28 = vor.u32 %v4111_v50, %v3708_v26  ;;  %v4119_v50 = vld [vmem:[#allocation10 + $0x20] sm:$0xff]  ;;  %v4118_v26 = vld [vmem:[#allocation10 + $0x18] sm:$0xff] }
 0x13c   :  { %2273 = vmatpush.bf16.msra.mxu0 %v3711_v28  ;;  %v4117_v28 = vld [vmem:[#allocation10 + $0x10] sm:$0xff] }
 0x13d   :  { %2261 = vmatpush.bf16.msra.mxu2 %v3631_v32  ;;  %v4109_v32 = vld [vmem:[#allocation8 + $0x1d4] sm:$0xf] }
 0x13e   :  { %v3703_v36 = vor.u32 %v4109_v32, %v3700_v8  ;;  %v4115_v32 = vld [vmem:[#allocation10] sm:$0xff] }
 0x13f   :  { %v4127_v8 = vld [vmem:[#allocation10 + $0x60] sm:$0xff] }
 0x140   :  { %2274 = vmatpush.bf16.msra.mxu0 %v3703_v36 }
 0x141   :  { %2262 = vmatpush.bf16.msra.mxu2 %v3623_v41  ;;  %v3692_v41 = vld [vmem:[#allocation8 + $0x1c8] sm:$0xf0] }
 0x142   :  { %v1641_v1 = vpop.f32.mrf.mxu1  ;;  %v3695_v44 = vor.u32 %v4107_v40, %v3692_v41  ;;  %v1848_v40 = vld [vmem:[%s4566_s4] sm:$0x3] }
 0x143   :  { %v1642_v23 = vadd.f32 %v1641_v1, %v1628_v12  ;;  %v3663_v1 = vor.u32 %v4099_v62, %v3660_v18  ;;  %v4123_v41 = vld [vmem:[#allocation10 + $0x40] sm:$0xff] }
 0x144   :  { %2275 = vmatpush.bf16.msra.mxu0 %v3695_v44 }
 0x145   :  { %2263 = vmatpush.bf16.msra.mxu2 %v3615_v51  ;;  %v1697_v35 = vpop.f32.mrf.mxu0  ;;  %v3676_v51 = vld [vmem:[#allocation8 + $0x1a8] sm:$0xf0] }
 0x148   :  { %2276 = vmatpush.bf16.msra.mxu0 %v3687_v48 }
 0x149   :  { %2264 = vmatpush.bf16.msra.mxu2 %v3607_v61 }
 0x14a   :  { %v1643_v20 = vpop.f32.mrf.mxu1 }
 0x14b   :  { %v1644_v27 = vadd.f32 %v1643_v20, %v1630_v24  ;;  %v4122_v20 = vld [vmem:[#allocation10 + $0x38] sm:$0xff]  ;;  %v4121_v24 = vld [vmem:[#allocation10 + $0x30] sm:$0xff] }
 0x14c   :  { %2424 = vmatpush.bf16.msrb.mxu3 %v4122_v20  ;;  %v4131_v20 = vld [vmem:[#allocation11] sm:$0xff] }
 0x14d   :  { %2265 = vmatpush.bf16.msra.mxu2 %v3599_v9  ;;  %v1655_v43 = vpop.f32.mrf.mxu3  ;;  %v1699_v60 = vpop.f32.mrf.mxu0 }
 0x14e   :  { %v1656_v25 = vadd.f32 %v1655_v43, %v1642_v23 }
 0x14f   :  { %v1683_v38 = vpop.f32.mrf.mxu2 }
 0x150   :  { %v1670_v30 = vadd.f32 %v1669_v56, %v1656_v25  ;;  %v1684_v53 = vadd.f32 %v1683_v38, %v356_v45  ;;  %v3679_v56 = vor.u32 %v4103_v49, %v3676_v51  ;;  %2425 = vmatpush.bf16.msrb.mxu3 %v4121_v24  ;;  %v4120_v25 = vld [vmem:[#allocation10 + $0x28] sm:$0xff]  ;;  %v4137_v51 = vld [vmem:[#allocation11 + $0x30] sm:$0xff]  ;;  %v4146_v24 = vld [vmem:[#allocation13 + $0x38] sm:$0xff] }
 0x152   :  { %v1774_v39 = vmax.f32 %v1670_v30, 0.0  ;;  %v1698_v57 = vadd.f32 %v1697_v35, %v1684_v53  ;;  %2277 = vmatpush.bf16.msra.mxu0 %v3679_v56  ;;  %v4116_v30 = vld [vmem:[#allocation10 + $0x8] sm:$0xff]  ;;  %v4125_v35 = vld [vmem:[#allocation10 + $0x50] sm:$0xff] }
 0x154   :  { %2426 = vmatpush.bf16.msrb.mxu3 %v4120_v25  ;;  %v4145_v25 = vld [vmem:[#allocation13 + $0x30] sm:$0xff] }
 0x155   :  { %v1657_v29 = vpop.f32.mrf.mxu3 }
 0x156   :  { %v1658_v31 = vadd.f32 %v1657_v29, %v1644_v27  ;;  %2278 = vmatpush.bf16.msra.mxu0 %v3671_v59  ;;  %v4130_v27 = vld [vmem:[#allocation10 + $0x78] sm:$0xff]  ;;  %v4129_v29 = vld [vmem:[#allocation10 + $0x70] sm:$0xff] }
 0x157   :  { %v1685_v37 = vpop.f32.mrf.mxu2  ;;  %2438 = vmatpush.bf16.msrb.mxu1 %v4130_v27 }
 0x158   :  { %v1672_v34 = vadd.f32 %v1671_v14, %v1658_v31  ;;  %v1686_v2 = vadd.f32 %v1685_v37, %v356_v45  ;;  %2427 = vmatpush.bf16.msrb.mxu3 %v4119_v50  ;;  %v4128_v31 = vld [vmem:[#allocation10 + $0x68] sm:$0xff] }
 0x159   :  { %v4144_v50 = vld [vmem:[#allocation13 + $0x28] sm:$0xff] }
 0x15a   :  { %v1778_v33 = vmax.f32 %v1672_v34, 0.0  ;;  %2279 = vmatpush.bf16.msra.mxu0 %v3663_v1  ;;  %v1700_v6 = vadd.f32 %v1699_v60, %v1686_v2  ;;  %v4126_v34 = vld [vmem:[#allocation10 + $0x58] sm:$0xff] }
 0x15b   :  { %2439 = vmatpush.bf16.msrb.mxu1 %v4129_v29  ;;  %v4168_v29 = vld [vmem:[%s4568_s6] ss:$0 sm:$0xff] }
 0x15c   :  { %v1782_v54 = vpack.c.bf16 %v1778_v33, %v1774_v39  ;;  %2428 = vmatpush.bf16.msrb.mxu3 %v4118_v26  ;;  %v4124_v33 = vld [vmem:[#allocation10 + $0x48] sm:$0xff]  ;;  %v4143_v26 = vld [vmem:[#allocation13 + $0x20] sm:$0xff] }
 0x15e   :  { %2210 = vmatmul.bf16.vlgmr.msrb.gmra.mxu2 %v1782_v54 }
 0x15f   :  { %2440 = vmatpush.bf16.msrb.mxu1 %v4128_v31  ;;  %2523 = vmatpush.bf16.msrb.mxu2 %v4138_v46 }
 0x160   :  { %2429 = vmatpush.bf16.msrb.mxu3 %v4117_v28 }
 0x162   :  { %v1711_v52 = vpop.f32.mrf.mxu1 }
 0x163   :  { %v1712_v63 = vadd.f32 %v1711_v52, %v1698_v57  ;;  %2441 = vmatpush.bf16.msrb.mxu1 %v4127_v8  ;;  %2524 = vmatpush.bf16.msrb.mxu2 %v4137_v51 }
 0x164   :  { %2430 = vmatpush.bf16.msrb.mxu3 %v4116_v30 }
 0x165   :  { %v1753_v4 = vpop.f32.mrf.mxu0 }
 0x167   :  { %2442 = vmatpush.bf16.msrb.mxu1 %v4126_v34 }
 0x168   :  { %2431 = vmatpush.bf16.msrb.mxu3 %v4115_v32 }
 0x16a   :  { %v1713_v61 = vpop.f32.mrf.mxu1 }
 0x16b   :  { %v1714_v7 = vadd.f32 %v1713_v61, %v1700_v6  ;;  %2443 = vmatpush.bf16.msrb.mxu1 %v4125_v35 }
 0x16d   :  { %v1725_v0 = vpop.f32.mrf.mxu3  ;;  %v1755_v15 = vpop.f32.mrf.mxu0 }
 0x16e   :  { %v1739_v3 = vpop.f32.mrf.mxu2  ;;  %v1726_v5 = vadd.f32 %v1725_v0, %v1712_v63  ;;  %2266 = vmatmul.bf16.vlgmr.msra.gmra.mxu2 %v1782_v54  ;;  %v1850_v54 = vperm.slane %v1848_v40, 0  ;;  %v1851_v0 = vperm.slane %v1848_v40, 1  ;;  %v4141_v40 = vld [vmem:[#allocation13 + $0x10] sm:$0xff] }
 0x16f   :  { %2444 = vmatpush.bf16.msrb.mxu1 %v4124_v33  ;;  %v4142_v33 = vld [vmem:[#allocation13 + $0x18] sm:$0xff] }
 0x170   :  { %v1740_v9 = vadd.f32 %v1739_v3, %v1726_v5 }
 0x172   :  { %v1767_v10 = vpop.f32.mrf.mxu1  ;;  %v1754_v12 = vadd.f32 %v1753_v4, %v1740_v9 }
 0x173   :  { %2445 = vmatpush.bf16.msrb.mxu1 %v4123_v41  ;;  %v4140_v41 = vld [vmem:[#allocation13 + $0x8] sm:$0xff] }
 0x174   :  { %v1768_v17 = vadd.f32 %v1767_v10, %v1754_v12 }
 0x175   :  { %v1727_v11 = vpop.f32.mrf.mxu3 }
 0x176   :  { %v1728_v43 = vadd.f32 %v1727_v11, %v1714_v7  ;;  %v1741_v13 = vpop.f32.mrf.mxu2  ;;  %v1775_v22 = vmax.f32 %v1768_v17, 0.0 }
 0x178   :  { %v1742_v14 = vadd.f32 %v1741_v13, %v1728_v43 }
 0x17a   :  { %v1756_v16 = vadd.f32 %v1755_v15, %v1742_v14  ;;  %v1769_v19 = vpop.f32.mrf.mxu1 }
 0x17c   :  { %v1770_v21 = vadd.f32 %v1769_v19, %v1756_v16  ;;  %v4136_v19 = vld [vmem:[#allocation11 + $0x28] sm:$0xff] }
 0x17d   :  { %2525 = vmatpush.bf16.msrb.mxu2 %v4136_v19 }
 0x17e   :  { %v1779_v23 = vmax.f32 %v1770_v21, 0.0  ;;  %v4135_v21 = vld [vmem:[#allocation11 + $0x20] sm:$0xff] }
 0x180   :  { %v1783_v55 = vpack.c.bf16 %v1779_v23, %v1775_v22  ;;  %v4134_v22 = vld [vmem:[#allocation11 + $0x18] sm:$0xff]  ;;  %v4133_v23 = vld [vmem:[#allocation11 + $0x10] sm:$0xff] }
 0x181   :  { %2526 = vmatpush.bf16.msrb.mxu2 %v4135_v21 }
 0x182   :  { %2224 = vmatmul.bf16.vlgmr.msrb.gmra.mxu0 %v1783_v55 }
 0x183   :  { %2608 = vmatpush.bf16.msrb.mxu0 %v4146_v24 }
 0x185   :  { %2527 = vmatpush.bf16.msrb.mxu2 %v4134_v22 }
 0x187   :  { %2609 = vmatpush.bf16.msrb.mxu0 %v4145_v25 }
 0x189   :  { %2528 = vmatpush.bf16.msrb.mxu2 %v4133_v23 }
 0x18b   :  { %2610 = vmatpush.bf16.msrb.mxu0 %v4144_v50 }
 0x18d   :  { %v2183_v36 = vpop.f32.mrf.mxu3 }
 0x18e   :  { %v2184_v49 = vadd.f32 %v2183_v36, %v1850_v54 }
 0x18f   :  { %2611 = vmatpush.bf16.msrb.mxu0 %v4143_v26 }
 0x192   :  { %2280 = vmatmul.bf16.vlgmr.msra.gmra.mxu0 %v1783_v55  ;;  %v4132_v55 = vld [vmem:[#allocation11 + $0x8] sm:$0xff] }
 0x193   :  { %2529 = vmatpush.bf16.msrb.mxu2 %v4132_v55  ;;  %2612 = vmatpush.bf16.msrb.mxu0 %v4142_v33 }
 0x195   :  { %v2185_v44 = vpop.f32.mrf.mxu3 }
 0x196   :  { %v2186_v52 = vadd.f32 %v2185_v44, %v1850_v54  ;;  %v4139_v54 = vld [vmem:[#allocation13] sm:$0xff] }
 0x197   :  { %2530 = vmatpush.bf16.msrb.mxu2 %v4131_v20  ;;  %2613 = vmatpush.bf16.msrb.mxu0 %v4141_v40 }
 0x19b   :  { %2614 = vmatpush.bf16.msrb.mxu0 %v4140_v41 }
 0x19f   :  { %2615 = vmatpush.bf16.msrb.mxu0 %v4139_v54 }
 0x1a5   :  { %v2197_v38 = vpop.f32.mrf.mxu1 }
 0x1a6   :  { %v2198_v53 = vadd.f32 %v2197_v38, %v2184_v49 }
 0x1ad   :  { %v2199_v45 = vpop.f32.mrf.mxu1  ;;  %v2239_v37 = vpop.f32.mrf.mxu3 }
 0x1ae   :  { %v2200_v60 = vadd.f32 %v2199_v45, %v2186_v52  ;;  %v2240_v4 = vadd.f32 %v2239_v37, %v1851_v0  ;;  %v4169_v45 = vld [vmem:[%s4570_s8] ss:$0 sm:$0xff] }
 0x1b5   :  { %v2253_v58 = vpop.f32.mrf.mxu1  ;;  %v2241_v2 = vpop.f32.mrf.mxu3 }
 0x1b6   :  { %v2242_v6 = vadd.f32 %v2241_v2, %v1851_v0  ;;  %v2254_v9 = vadd.f32 %v2253_v58, %v2240_v4 }
 0x1bd   :  { %v2255_v5 = vpop.f32.mrf.mxu1 }
 0x1be   :  { %v2256_v10 = vadd.f32 %v2255_v5, %v2242_v6 }
 0x1e1   :  { %v2211_v39 = vpop.f32.mrf.mxu2 }
 0x1e2   :  { %v2212_v56 = vadd.f32 %v2211_v39, %v2198_v53 }
 0x1e9   :  { %v2213_v47 = vpop.f32.mrf.mxu2 }
 0x1ea   :  { %v2214_v57 = vadd.f32 %v2213_v47, %v2200_v60  ;;  %v4170_v60 = vld [vmem:[%s4572_s10] ss:$0 sm:$0xff] }
 0x1f1   :  { %v2267_v18 = vpop.f32.mrf.mxu2 }
 0x1f2   :  { %v2268_v11 = vadd.f32 %v2267_v18, %v2254_v9 }
 0x1f9   :  { %v2269_v7 = vpop.f32.mrf.mxu2 }
 0x1fa   :  { %v2270_v43 = vadd.f32 %v2269_v7, %v2256_v10 }
 0x1ff   :  { %v2225_v48 = vpop.f32.mrf.mxu0 }
 0x200   :  { %v2226_v42 = vadd.f32 %v2225_v48, %v2212_v56 }
 0x202   :  { %v2286_v61 = vmax.f32 %v2226_v42, 0.0 }
 0x207   :  { %v2227_v59 = vpop.f32.mrf.mxu0 }
 0x208   :  { %v2228_v62 = vadd.f32 %v2227_v59, %v2214_v57 }
 0x20a   :  { %v2288_v63 = vmax.f32 %v2228_v62, 0.0 }
 0x20c   :  { %v2290_v1 = vpack.c.bf16 %v2288_v63, %v2286_v61 }
 0x20e   :  { %2432 = vmatmul.bf16.vlgmr.msrb.gmra.mxu3 %v2290_v1 }
 0x20f   :  { %v2281_v3 = vpop.f32.mrf.mxu0 }
 0x210   :  { %v2282_v12 = vadd.f32 %v2281_v3, %v2268_v11 }
 0x212   :  { %v2287_v15 = vmax.f32 %v2282_v12, 0.0 }
 0x217   :  { %v2283_v13 = vpop.f32.mrf.mxu0 }
 0x218   :  { %v2284_v14 = vadd.f32 %v2283_v13, %v2270_v43 }
 0x21a   :  { %v2289_v16 = vmax.f32 %v2284_v14, 0.0 }
 0x21c   :  { %v2291_v17 = vpack.c.bf16 %v2289_v16, %v2287_v15 }
 0x21e   :  { %2446 = vmatmul.bf16.vlgmr.msrb.gmra.mxu1 %v2291_v17 }
 0x291   :  { %v2433_v27 = vpop.f32.mrf.mxu3 }
 0x292   :  { %v2434_v31 = vadd.f32 %v4168_v29, %v2433_v27 }
 0x299   :  { %v2435_v30 = vpop.f32.mrf.mxu3 }
 0x29a   :  { %v2436_v32 = vadd.f32 %v4168_v29, %v2435_v30 }
 0x29b   :  { %v2447_v28 = vpop.f32.mrf.mxu1 }
 0x29c   :  { %v2448_v8 = vadd.f32 %v2447_v28, %v2434_v31 }
 0x29e   :  { %v2452_v36 = vmax.f32 %v2448_v8, 0.0 }
 0x2a3   :  { %v2449_v34 = vpop.f32.mrf.mxu1 }
 0x2a4   :  { %v2450_v35 = vadd.f32 %v2449_v34, %v2436_v32 }
 0x2a6   :  { %v2453_v38 = vmax.f32 %v2450_v35, 0.0 }
 0x2a8   :  { %v2454_v39 = vpack.c.bf16 %v2453_v38, %v2452_v36 }
 0x2aa   :  { %2531 = vmatmul.bf16.vlgmr.msrb.gmra.mxu2 %v2454_v39 }
 0x32d   :  { %v2532_v44 = vpop.f32.mrf.mxu2 }
 0x32e   :  { %v2533_v46 = vadd.f32 %v4169_v45, %v2532_v44 }
 0x330   :  { %v2537_v49 = vmax.f32 %v2533_v46, 0.0 }
 0x335   :  { %v2534_v47 = vpop.f32.mrf.mxu2 }
 0x336   :  { %v2535_v48 = vadd.f32 %v4169_v45, %v2534_v47 }
 0x338   :  { %v2538_v51 = vmax.f32 %v2535_v48, 0.0 }
 0x33a   :  { %v2539_v52 = vpack.c.bf16 %v2538_v51, %v2537_v49 }
 0x33c   :  { %2616 = vmatmul.bf16.vlgmr.msrb.gmra.mxu0 %v2539_v52 }
 0x3b9   :  { %v2617_v53 = vpop.f32.mrf.mxu0 }
 0x3ba   :  { %v2618_v37 = vadd.f32 %v4170_v60, %v2617_v53 }
 0x3c1   :  { %v2619_v56 = vpop.f32.mrf.mxu0 }
 0x3c2   :  { %v2620_v57 = vadd.f32 %v4170_v60, %v2619_v56 }
 0x3c4   :  { %v4150_v42 = vpack.c.bf16 %v2620_v57, %v2618_v37 }
 0x3c6   :  { %4151 = vst [vmem:[#allocation14] sm:$0xff] %v4150_v42  }
 0x3c7   :  { %2638 = dma.vmem_to_hbm [thread:$0]  %s2631_s22, 128, %s2633_s24, [#allocation4], %s4380_s18, %s4380_s18, %s4381_s19  }
 0x3c8   :  { %4371 = dma.done.wait [#allocation4], 128  }
 0x3c9   :  { %4372 = vsyncadd [#allocation4], 4294967168 }
 0x3ca   :  { %2643 = vsyncpa [#allocation3], 1 }
 0x3cb   :  { %2644 = vsyncpa [#allocation6], 1 }
 0x3cc   :  { %2645 = vsyncpa [#allocation9], 1 }
 0x3cd   :  { %2646 = vsyncpa [#allocation12], 1 }
 0x3ce   :  { %2647 = vsyncpa [#allocation4], 1 }

</bundles_post_ra>
